<compile_context>
chip_gen: v6e
topology: v6e:2x2x1
jax: 0.10.0
libtpu: 0.0.40
codegen_flags: <defaults>
</compile_context>

<pallas_src>
import functools

import jax
import jax.numpy as jnp
from jax import lax
from jax.experimental import pallas as pl
from jax.experimental.pallas import tpu as pltpu


def rcab_kernel(x_ref, mask_ref, w1_ref, b1_ref, w2_ref, b2_ref,
                wd_ref, bd_ref, wu_ref, bu_ref,
                o_ref, col_ref, *, H, W, res_scale):
    """One batch element.  Channels on sublanes, flattened H*W on lanes.

    x_ref   : (1, C, H*W)  f32   input block
    mask_ref: (9, H*W)     f32   per-tap border masks (row 4 = center = ones)
    w1/w2   : (3, C, 3*C)  bf16  conv weights, [dy, co, (dx*C + ci)]
    b1/b2   : (C, 1)       f32
    wd_ref  : (C, Csq)     f32   CA down-projection weight, [ci, j]
    bd_ref  : (1, Csq)     f32
    wu_ref  : (C, Csq)     f32   CA up-projection weight, [co, j]
    bu_ref  : (C, 1)       f32
    col_ref : (9*C, H*W)   bf16  VMEM im2col scratch (reused by both convs)
    """
    _, C, HW = x_ref.shape

    x2 = x_ref[0].astype(jnp.float32)                           # (C, H*W)

    def conv3x3(inp, wt_ref, b_ref):
        # Build the im2col buffer one dy-row (3 taps) at a time and issue the
        # matching (C, 3C) x (3C, HW) MXU chunk immediately; the scheduler can
        # overlap each chunk's matmul with the next group's roll/mask/store.
        acc = None
        for g in range(3):                                      # dy = g - 1
            for j in range(3):                                  # dx = j - 1
                k = 3 * g + j
                shift = (g - 1) * W + (j - 1)
                if shift == 0:
                    tap = inp
                else:
                    tap = (pltpu.roll(inp, (-shift) % HW, axis=1)
                           * mask_ref[k:k + 1, :])              # f32 VPU mul
                col_ref[k * C:(k + 1) * C, :] = tap.astype(jnp.bfloat16)
            lo, hi = 3 * g * C, 3 * (g + 1) * C
            part = jnp.dot(wt_ref[g], col_ref[lo:hi, :],
                           preferred_element_type=jnp.float32)  # bf16 MXU
            acc = part if acc is None else acc + part
        return acc + b_ref[...]                                 # (C, H*W) f32

    # rcab body: conv -> ReLU -> conv
    h1 = jnp.maximum(conv3x3(x2, w1_ref, b1_ref), 0.0)          # (C, H*W)
    h2 = conv3x3(h1, w2_ref, b2_ref)                            # (C, H*W)

    # Channel attention: GAP -> 1x1 down -> ReLU -> 1x1 up -> sigmoid (f32).
    y = jnp.mean(h2, axis=1, keepdims=True)                     # (C, 1)
    z = jnp.maximum(jnp.sum(wd_ref[...] * y, axis=0, keepdims=True)
                    + bd_ref[...], 0.0)                         # (1, Csq)
    att = jax.nn.sigmoid(jnp.sum(wu_ref[...] * z, axis=1, keepdims=True)
                         + bu_ref[...])                         # (C, 1)

    # Fold res_scale into the per-channel attention vector, then residual add.
    o_ref[0] = (h2 * (att * res_scale) + x2).astype(o_ref.dtype)


def rcab_forward(x_nchw, params, res_scale=1.0):
    """RCAB forward.  x_nchw: (N, C, H, W) like PyTorch; returns (N, C, H, W)."""
    N, C, H, W = x_nchw.shape
    HW = H * W
    x = x_nchw.reshape(N, C, HW)                    # contiguous, no transpose

    # Conv weights HWIO (3,3,C,C) -> (C_out, 9*C_in) in im2col order, then
    # grouped per dy-row as (3, C_out, 3*C_in) and pre-cast to bf16 so the
    # MXU runs at native rate on v5e/v6e/v7x.
    def prep_conv_w(w):
        wt = w.reshape(9 * C, C).T                  # (C_out, 9*C_in)
        return wt.reshape(C, 3, 3 * C).transpose(1, 0, 2).astype(jnp.bfloat16)

    w1g = prep_conv_w(params["w1"])
    w2g = prep_conv_w(params["w2"])
    b1c = params["b1"].reshape(C, 1)
    b2c = params["b2"].reshape(C, 1)
    wut = params["wu"].T                            # (Csq, C) -> (C, Csq)
    buc = params["bu"].reshape(C, 1)

    # Per-tap border-validity masks over the flattened spatial (lane) axis,
    # computed once on the host instead of per grid step in the kernel.
    r = jnp.arange(HW, dtype=jnp.int32)
    hh, ww = r // W, r % W
    masks = []
    for dy in (-1, 0, 1):
        for dx in (-1, 0, 1):
            masks.append((hh + dy >= 0) & (hh + dy < H)
                         & (ww + dx >= 0) & (ww + dx < W))
    mask = jnp.stack(masks).astype(jnp.float32)     # (9, HW)

    def full(a):
        return pl.BlockSpec(a.shape, lambda n: (0,) * a.ndim)

    kernel = functools.partial(rcab_kernel, H=H, W=W,
                               res_scale=float(res_scale))
    out = pl.pallas_call(
        kernel,
        out_shape=jax.ShapeDtypeStruct((N, C, HW), x.dtype),
        grid_spec=pltpu.PrefetchScalarGridSpec(
            num_scalar_prefetch=0,
            grid=(N,),
            in_specs=[
                pl.BlockSpec((1, C, HW), lambda n: (n, 0, 0)),   # x
                full(mask),                                      # tap masks
                full(w1g), full(b1c),                            # conv1
                full(w2g), full(b2c),                            # conv2
                full(params["wd"]), full(params["bd"]),          # CA down
                full(wut), full(buc),                            # CA up
            ],
            out_specs=pl.BlockSpec((1, C, HW), lambda n: (n, 0, 0)),
            scratch_shapes=[pltpu.VMEM((9 * C, HW), jnp.bfloat16)],
        ),
        compiler_params=pltpu.CompilerParams(
            dimension_semantics=("parallel",),       # v7x: batch over 2 TCs
            vmem_limit_bytes=48 * 1024 * 1024),
    )(x, mask, w1g, b1c, w2g, b2c, params["wd"], params["bd"], wut, buc)

    return out.reshape(N, C, H, W)


def rcab_reference(x_nchw, params, res_scale=1.0, conv_dtype=jnp.float32):
    """Pure-JAX reference (matches the PyTorch module semantics).

    conv_dtype=bfloat16 reproduces the kernel's MXU precision (bf16 operands,
    f32 accumulation) for a tight numerical check.
    """
    x = jnp.transpose(x_nchw, (0, 2, 3, 1))                    # NHWC
    dn = ("NHWC", "HWIO", "NHWC")

    def conv(inp, w, b):
        return lax.conv_general_dilated(
            inp.astype(conv_dtype), w.astype(conv_dtype), (1, 1), "SAME",
            dimension_numbers=dn,
            preferred_element_type=jnp.float32) + b

    h1 = jnp.maximum(conv(x, params["w1"], params["b1"]), 0.0)
    h2 = conv(h1, params["w2"], params["b2"])
    y = jnp.mean(h2, axis=(1, 2), keepdims=True)               # (N,1,1,C)
    z = jnp.maximum(jnp.einsum("nijc,cd->nijd", y, params["wd"])
                    + params["bd"], 0.0)
    att = jax.nn.sigmoid(jnp.einsum("nijd,dc->nijc", z, params["wu"])
                         + params["bu"])
    out = h2 * att * res_scale + x
    return jnp.transpose(out, (0, 3, 1, 2))


def make_params(key, num_feat, squeeze_factor):
    C, Csq = num_feat, num_feat // squeeze_factor
    ks = jax.random.split(key, 8)
    s = 0.05
    return {
        "w1": jax.random.normal(ks[0], (3, 3, C, C), jnp.float32) * s,
        "b1": jax.random.normal(ks[1], (1, C), jnp.float32) * s,
        "w2": jax.random.normal(ks[2], (3, 3, C, C), jnp.float32) * s,
        "b2": jax.random.normal(ks[3], (1, C), jnp.float32) * s,
        "wd": jax.random.normal(ks[4], (C, Csq), jnp.float32) * s,
        "bd": jax.random.normal(ks[5], (1, Csq), jnp.float32) * s,
        "wu": jax.random.normal(ks[6], (Csq, C), jnp.float32) * s,
        "bu": jax.random.normal(ks[7], (1, C), jnp.float32) * s,
    }


if __name__ == "__main__":
    num_feat = 32
    squeeze_factor = 4
    res_scale = 1.0
    N, H, W = 2, 16, 16

    key = jax.random.PRNGKey(0)
    k_param, k_x = jax.random.split(key)
    params = make_params(k_param, num_feat, squeeze_factor)
    x = jax.random.normal(k_x, (N, num_feat, H, W), jnp.float32)  # NCHW

    out = jax.block_until_ready(rcab_forward(x, params, res_scale))
    assert out.shape == x.shape

    # Tight check against a reference that uses the same MXU precision
    # (bf16 conv operands, f32 accumulation) -> validates kernel logic.
    ref_bf16 = rcab_reference(x, params, res_scale, conv_dtype=jnp.bfloat16)
    err_b = float(jnp.max(jnp.abs(out - ref_bf16)))
    assert jnp.allclose(out, ref_bf16, rtol=2e-3, atol=2e-3), err_b

    # Loose sanity check against the exact f32 reference (quantization error
    # of the bf16 conv operands only).
    ref_f32 = rcab_reference(x, params, res_scale)
    err_f = float(jnp.max(jnp.abs(out - ref_f32)))
    assert jnp.allclose(out, ref_f32, rtol=3e-2, atol=3e-2), err_f

    print("KERNEL_OK")
</pallas_src>

<mosaic_0001>
module attributes {stable_mosaic.version = 11 : i64} {
  func.func @rcab_kernel(%arg0: i32, %arg1: memref<1x32x256xf32, #tpu.memory_space<vmem>>, %arg2: memref<9x256xf32, #tpu.memory_space<vmem>>, %arg3: memref<3x32x96xbf16, #tpu.memory_space<vmem>>, %arg4: memref<32x1xf32, #tpu.memory_space<vmem>>, %arg5: memref<3x32x96xbf16, #tpu.memory_space<vmem>>, %arg6: memref<32x1xf32, #tpu.memory_space<vmem>>, %arg7: memref<32x8xf32, #tpu.memory_space<vmem>>, %arg8: memref<1x8xf32, #tpu.memory_space<vmem>>, %arg9: memref<32x8xf32, #tpu.memory_space<vmem>>, %arg10: memref<32x1xf32, #tpu.memory_space<vmem>>, %arg11: memref<1x32x256xf32, #tpu.memory_space<vmem>>, %arg12: memref<288x256xbf16, #tpu.memory_space<vmem>>) attributes {dimension_semantics = [#tpu.dimension_semantics<parallel>], iteration_bounds = array<i64: 2>, scalar_prefetch = 0 : i64, scratch_operands = 1 : i64, tpu.core_type = #tpu.core_type<tc>, window_params = [{transform_indices = @transform_0, window_bounds = array<i64: 1, 32, 256>}, {pipeline_mode = #tpu.pipeline_mode<synchronous>, transform_indices = @transform_1, window_bounds = array<i64: 9, 256>}, {pipeline_mode = #tpu.pipeline_mode<synchronous>, transform_indices = @transform_2, window_bounds = array<i64: 3, 32, 96>}, {pipeline_mode = #tpu.pipeline_mode<synchronous>, transform_indices = @transform_3, window_bounds = array<i64: 32, 1>}, {pipeline_mode = #tpu.pipeline_mode<synchronous>, transform_indices = @transform_4, window_bounds = array<i64: 3, 32, 96>}, {pipeline_mode = #tpu.pipeline_mode<synchronous>, transform_indices = @transform_5, window_bounds = array<i64: 32, 1>}, {pipeline_mode = #tpu.pipeline_mode<synchronous>, transform_indices = @transform_6, window_bounds = array<i64: 32, 8>}, {pipeline_mode = #tpu.pipeline_mode<synchronous>, transform_indices = @transform_7, window_bounds = array<i64: 1, 8>}, {pipeline_mode = #tpu.pipeline_mode<synchronous>, transform_indices = @transform_8, window_bounds = array<i64: 32, 8>}, {pipeline_mode = #tpu.pipeline_mode<synchronous>, transform_indices = @transform_9, window_bounds = array<i64: 32, 1>}, {transform_indices = @transform_10, window_bounds = array<i64: 1, 32, 256>}]} {
    %c0 = arith.constant 0 : index
    %c0_0 = arith.constant 0 : index
    %c0_1 = arith.constant 0 : index
    %0 = vector.load %arg1[%c0, %c0_0, %c0_1] : memref<1x32x256xf32, #tpu.memory_space<vmem>>, vector<1x32x256xf32>
    %1 = vector.shape_cast %0 : vector<1x32x256xf32> to vector<32x256xf32>
    %c17_i32 = arith.constant 17 : i32
    %2 = tpu.dynamic_rotate %1 by %c17_i32 dim 1 : vector<32x256xf32>, i32 -> vector<32x256xf32>
    %c0_2 = arith.constant 0 : index
    %c0_3 = arith.constant 0 : index
    %3 = vector.load %arg2[%c0_2, %c0_3] : memref<9x256xf32, #tpu.memory_space<vmem>>, vector<1x256xf32>
    %4 = vector.broadcast %3 : vector<1x256xf32> to vector<32x256xf32>
    %5 = arith.mulf %2, %4 : vector<32x256xf32>
    %6 = arith.truncf %5 : vector<32x256xf32> to vector<32x256xbf16>
    %c0_4 = arith.constant 0 : index
    %c0_5 = arith.constant 0 : index
    %7 = vector.load %arg12[%c0_4, %c0_5] : memref<288x256xbf16, #tpu.memory_space<vmem>>, vector<32x256xbf16>
    tpu.vector_store %arg12[%c0_4, %c0_5], %6 {strides = array<i32>} : memref<288x256xbf16, #tpu.memory_space<vmem>>, vector<32x256xbf16>,
    %c16_i32 = arith.constant 16 : i32
    %8 = tpu.dynamic_rotate %1 by %c16_i32 dim 1 : vector<32x256xf32>, i32 -> vector<32x256xf32>
    %c1 = arith.constant 1 : index
    %c0_6 = arith.constant 0 : index
    %9 = vector.load %arg2[%c1, %c0_6] : memref<9x256xf32, #tpu.memory_space<vmem>>, vector<1x256xf32>
    %10 = vector.broadcast %9 : vector<1x256xf32> to vector<32x256xf32>
    %11 = arith.mulf %8, %10 : vector<32x256xf32>
    %12 = arith.truncf %11 : vector<32x256xf32> to vector<32x256xbf16>
    %c32 = arith.constant 32 : index
    %c0_7 = arith.constant 0 : index
    %13 = vector.load %arg12[%c32, %c0_7] : memref<288x256xbf16, #tpu.memory_space<vmem>>, vector<32x256xbf16>
    tpu.vector_store %arg12[%c32, %c0_7], %12 {strides = array<i32>} : memref<288x256xbf16, #tpu.memory_space<vmem>>, vector<32x256xbf16>,
    %c15_i32 = arith.constant 15 : i32
    %14 = tpu.dynamic_rotate %1 by %c15_i32 dim 1 : vector<32x256xf32>, i32 -> vector<32x256xf32>
    %c2 = arith.constant 2 : index
    %c0_8 = arith.constant 0 : index
    %15 = vector.load %arg2[%c2, %c0_8] : memref<9x256xf32, #tpu.memory_space<vmem>>, vector<1x256xf32>
    %16 = vector.broadcast %15 : vector<1x256xf32> to vector<32x256xf32>
    %17 = arith.mulf %14, %16 : vector<32x256xf32>
    %18 = arith.truncf %17 : vector<32x256xf32> to vector<32x256xbf16>
    %c64 = arith.constant 64 : index
    %c0_9 = arith.constant 0 : index
    %19 = vector.load %arg12[%c64, %c0_9] : memref<288x256xbf16, #tpu.memory_space<vmem>>, vector<32x256xbf16>
    tpu.vector_store %arg12[%c64, %c0_9], %18 {strides = array<i32>} : memref<288x256xbf16, #tpu.memory_space<vmem>>, vector<32x256xbf16>,
    %c0_10 = arith.constant 0 : index
    %c0_11 = arith.constant 0 : index
    %c0_12 = arith.constant 0 : index
    %20 = vector.load %arg3[%c0_10, %c0_11, %c0_12] : memref<3x32x96xbf16, #tpu.memory_space<vmem>>, vector<1x32x96xbf16>
    %21 = vector.shape_cast %20 : vector<1x32x96xbf16> to vector<32x96xbf16>
    %c0_13 = arith.constant 0 : index
    %c0_14 = arith.constant 0 : index
    %22 = vector.load %arg12[%c0_13, %c0_14] : memref<288x256xbf16, #tpu.memory_space<vmem>>, vector<96x256xbf16>
    %cst = arith.constant dense<0.000000e+00> : vector<32x256xf32>
    %23 = tpu.matmul %21, %22, %cst {dimension_numbers = #tpu.dot_dimension_numbers<[1], [0], [0], [1], [0, 0, 1, 1], [], []>} : vector<32x96xbf16>, vector<96x256xbf16>, vector<32x256xf32> -> vector<32x256xf32>
    %c1_i32 = arith.constant 1 : i32
    %24 = tpu.dynamic_rotate %1 by %c1_i32 dim 1 : vector<32x256xf32>, i32 -> vector<32x256xf32>
    %c3 = arith.constant 3 : index
    %c0_15 = arith.constant 0 : index
    %25 = vector.load %arg2[%c3, %c0_15] : memref<9x256xf32, #tpu.memory_space<vmem>>, vector<1x256xf32>
    %26 = vector.broadcast %25 : vector<1x256xf32> to vector<32x256xf32>
    %27 = arith.mulf %24, %26 : vector<32x256xf32>
    %28 = arith.truncf %27 : vector<32x256xf32> to vector<32x256xbf16>
    %c96 = arith.constant 96 : index
    %c0_16 = arith.constant 0 : index
    %29 = vector.load %arg12[%c96, %c0_16] : memref<288x256xbf16, #tpu.memory_space<vmem>>, vector<32x256xbf16>
    tpu.vector_store %arg12[%c96, %c0_16], %28 {strides = array<i32>} : memref<288x256xbf16, #tpu.memory_space<vmem>>, vector<32x256xbf16>,
    %30 = arith.truncf %1 : vector<32x256xf32> to vector<32x256xbf16>
    %c128 = arith.constant 128 : index
    %c0_17 = arith.constant 0 : index
    %31 = vector.load %arg12[%c128, %c0_17] : memref<288x256xbf16, #tpu.memory_space<vmem>>, vector<32x256xbf16>
    tpu.vector_store %arg12[%c128, %c0_17], %30 {strides = array<i32>} : memref<288x256xbf16, #tpu.memory_space<vmem>>, vector<32x256xbf16>,
    %c255_i32 = arith.constant 255 : i32
    %32 = tpu.dynamic_rotate %1 by %c255_i32 dim 1 : vector<32x256xf32>, i32 -> vector<32x256xf32>
    %c5 = arith.constant 5 : index
    %c0_18 = arith.constant 0 : index
    %33 = vector.load %arg2[%c5, %c0_18] : memref<9x256xf32, #tpu.memory_space<vmem>>, vector<1x256xf32>
    %34 = vector.broadcast %33 : vector<1x256xf32> to vector<32x256xf32>
    %35 = arith.mulf %32, %34 : vector<32x256xf32>
    %36 = arith.truncf %35 : vector<32x256xf32> to vector<32x256xbf16>
    %c160 = arith.constant 160 : index
    %c0_19 = arith.constant 0 : index
    %37 = vector.load %arg12[%c160, %c0_19] : memref<288x256xbf16, #tpu.memory_space<vmem>>, vector<32x256xbf16>
    tpu.vector_store %arg12[%c160, %c0_19], %36 {strides = array<i32>} : memref<288x256xbf16, #tpu.memory_space<vmem>>, vector<32x256xbf16>,
    %c1_20 = arith.constant 1 : index
    %c0_21 = arith.constant 0 : index
    %c0_22 = arith.constant 0 : index
    %38 = vector.load %arg3[%c1_20, %c0_21, %c0_22] : memref<3x32x96xbf16, #tpu.memory_space<vmem>>, vector<1x32x96xbf16>
    %39 = vector.shape_cast %38 : vector<1x32x96xbf16> to vector<32x96xbf16>
    %c96_23 = arith.constant 96 : index
    %c0_24 = arith.constant 0 : index
    %40 = vector.load %arg12[%c96_23, %c0_24] : memref<288x256xbf16, #tpu.memory_space<vmem>>, vector<96x256xbf16>
    %cst_25 = arith.constant dense<0.000000e+00> : vector<32x256xf32>
    %41 = tpu.matmul %39, %40, %cst_25 {dimension_numbers = #tpu.dot_dimension_numbers<[1], [0], [0], [1], [0, 0, 1, 1], [], []>} : vector<32x96xbf16>, vector<96x256xbf16>, vector<32x256xf32> -> vector<32x256xf32>
    %42 = arith.addf %23, %41 : vector<32x256xf32>
    %c241_i32 = arith.constant 241 : i32
    %43 = tpu.dynamic_rotate %1 by %c241_i32 dim 1 : vector<32x256xf32>, i32 -> vector<32x256xf32>
    %c6 = arith.constant 6 : index
    %c0_26 = arith.constant 0 : index
    %44 = vector.load %arg2[%c6, %c0_26] : memref<9x256xf32, #tpu.memory_space<vmem>>, vector<1x256xf32>
    %45 = vector.broadcast %44 : vector<1x256xf32> to vector<32x256xf32>
    %46 = arith.mulf %43, %45 : vector<32x256xf32>
    %47 = arith.truncf %46 : vector<32x256xf32> to vector<32x256xbf16>
    %c192 = arith.constant 192 : index
    %c0_27 = arith.constant 0 : index
    %48 = vector.load %arg12[%c192, %c0_27] : memref<288x256xbf16, #tpu.memory_space<vmem>>, vector<32x256xbf16>
    tpu.vector_store %arg12[%c192, %c0_27], %47 {strides = array<i32>} : memref<288x256xbf16, #tpu.memory_space<vmem>>, vector<32x256xbf16>,
    %c240_i32 = arith.constant 240 : i32
    %49 = tpu.dynamic_rotate %1 by %c240_i32 dim 1 : vector<32x256xf32>, i32 -> vector<32x256xf32>
    %c7 = arith.constant 7 : index
    %c0_28 = arith.constant 0 : index
    %50 = vector.load %arg2[%c7, %c0_28] : memref<9x256xf32, #tpu.memory_space<vmem>>, vector<1x256xf32>
    %51 = vector.broadcast %50 : vector<1x256xf32> to vector<32x256xf32>
    %52 = arith.mulf %49, %51 : vector<32x256xf32>
    %53 = arith.truncf %52 : vector<32x256xf32> to vector<32x256xbf16>
    %c224 = arith.constant 224 : index
    %c0_29 = arith.constant 0 : index
    %54 = vector.load %arg12[%c224, %c0_29] : memref<288x256xbf16, #tpu.memory_space<vmem>>, vector<32x256xbf16>
    tpu.vector_store %arg12[%c224, %c0_29], %53 {strides = array<i32>} : memref<288x256xbf16, #tpu.memory_space<vmem>>, vector<32x256xbf16>,
    %c239_i32 = arith.constant 239 : i32
    %55 = tpu.dynamic_rotate %1 by %c239_i32 dim 1 : vector<32x256xf32>, i32 -> vector<32x256xf32>
    %c8 = arith.constant 8 : index
    %c0_30 = arith.constant 0 : index
    %56 = vector.load %arg2[%c8, %c0_30] : memref<9x256xf32, #tpu.memory_space<vmem>>, vector<1x256xf32>
    %57 = vector.broadcast %56 : vector<1x256xf32> to vector<32x256xf32>
    %58 = arith.mulf %55, %57 : vector<32x256xf32>
    %59 = arith.truncf %58 : vector<32x256xf32> to vector<32x256xbf16>
    %c256 = arith.constant 256 : index
    %c0_31 = arith.constant 0 : index
    %60 = vector.load %arg12[%c256, %c0_31] : memref<288x256xbf16, #tpu.memory_space<vmem>>, vector<32x256xbf16>
    tpu.vector_store %arg12[%c256, %c0_31], %59 {strides = array<i32>} : memref<288x256xbf16, #tpu.memory_space<vmem>>, vector<32x256xbf16>,
    %c2_32 = arith.constant 2 : index
    %c0_33 = arith.constant 0 : index
    %c0_34 = arith.constant 0 : index
    %61 = vector.load %arg3[%c2_32, %c0_33, %c0_34] : memref<3x32x96xbf16, #tpu.memory_space<vmem>>, vector<1x32x96xbf16>
    %62 = vector.shape_cast %61 : vector<1x32x96xbf16> to vector<32x96xbf16>
    %c192_35 = arith.constant 192 : index
    %c0_36 = arith.constant 0 : index
    %63 = vector.load %arg12[%c192_35, %c0_36] : memref<288x256xbf16, #tpu.memory_space<vmem>>, vector<96x256xbf16>
    %cst_37 = arith.constant dense<0.000000e+00> : vector<32x256xf32>
    %64 = tpu.matmul %62, %63, %cst_37 {dimension_numbers = #tpu.dot_dimension_numbers<[1], [0], [0], [1], [0, 0, 1, 1], [], []>} : vector<32x96xbf16>, vector<96x256xbf16>, vector<32x256xf32> -> vector<32x256xf32>
    %65 = arith.addf %42, %64 : vector<32x256xf32>
    %c0_38 = arith.constant 0 : index
    %c0_39 = arith.constant 0 : index
    %66 = vector.load %arg4[%c0_38, %c0_39] : memref<32x1xf32, #tpu.memory_space<vmem>>, vector<32x1xf32>
    %67 = vector.broadcast %66 : vector<32x1xf32> to vector<32x256xf32>
    %68 = arith.addf %65, %67 : vector<32x256xf32>
    %cst_40 = arith.constant 0.000000e+00 : f32
    %69 = vector.broadcast %cst_40 : f32 to vector<32x256xf32>
    %70 = arith.maximumf %68, %69 : vector<32x256xf32>
    %c17_i32_41 = arith.constant 17 : i32
    %71 = tpu.dynamic_rotate %70 by %c17_i32_41 dim 1 : vector<32x256xf32>, i32 -> vector<32x256xf32>
    %c0_42 = arith.constant 0 : index
    %c0_43 = arith.constant 0 : index
    %72 = vector.load %arg2[%c0_42, %c0_43] : memref<9x256xf32, #tpu.memory_space<vmem>>, vector<1x256xf32>
    %73 = vector.broadcast %72 : vector<1x256xf32> to vector<32x256xf32>
    %74 = arith.mulf %71, %73 : vector<32x256xf32>
    %75 = arith.truncf %74 : vector<32x256xf32> to vector<32x256xbf16>
    %c0_44 = arith.constant 0 : index
    %c0_45 = arith.constant 0 : index
    %76 = vector.load %arg12[%c0_44, %c0_45] : memref<288x256xbf16, #tpu.memory_space<vmem>>, vector<32x256xbf16>
    tpu.vector_store %arg12[%c0_44, %c0_45], %75 {strides = array<i32>} : memref<288x256xbf16, #tpu.memory_space<vmem>>, vector<32x256xbf16>,
    %c16_i32_46 = arith.constant 16 : i32
    %77 = tpu.dynamic_rotate %70 by %c16_i32_46 dim 1 : vector<32x256xf32>, i32 -> vector<32x256xf32>
    %c1_47 = arith.constant 1 : index
    %c0_48 = arith.constant 0 : index
    %78 = vector.load %arg2[%c1_47, %c0_48] : memref<9x256xf32, #tpu.memory_space<vmem>>, vector<1x256xf32>
    %79 = vector.broadcast %78 : vector<1x256xf32> to vector<32x256xf32>
    %80 = arith.mulf %77, %79 : vector<32x256xf32>
    %81 = arith.truncf %80 : vector<32x256xf32> to vector<32x256xbf16>
    %c32_49 = arith.constant 32 : index
    %c0_50 = arith.constant 0 : index
    %82 = vector.load %arg12[%c32_49, %c0_50] : memref<288x256xbf16, #tpu.memory_space<vmem>>, vector<32x256xbf16>
    tpu.vector_store %arg12[%c32_49, %c0_50], %81 {strides = array<i32>} : memref<288x256xbf16, #tpu.memory_space<vmem>>, vector<32x256xbf16>,
    %c15_i32_51 = arith.constant 15 : i32
    %83 = tpu.dynamic_rotate %70 by %c15_i32_51 dim 1 : vector<32x256xf32>, i32 -> vector<32x256xf32>
    %c2_52 = arith.constant 2 : index
    %c0_53 = arith.constant 0 : index
    %84 = vector.load %arg2[%c2_52, %c0_53] : memref<9x256xf32, #tpu.memory_space<vmem>>, vector<1x256xf32>
    %85 = vector.broadcast %84 : vector<1x256xf32> to vector<32x256xf32>
    %86 = arith.mulf %83, %85 : vector<32x256xf32>
    %87 = arith.truncf %86 : vector<32x256xf32> to vector<32x256xbf16>
    %c64_54 = arith.constant 64 : index
    %c0_55 = arith.constant 0 : index
    %88 = vector.load %arg12[%c64_54, %c0_55] : memref<288x256xbf16, #tpu.memory_space<vmem>>, vector<32x256xbf16>
    tpu.vector_store %arg12[%c64_54, %c0_55], %87 {strides = array<i32>} : memref<288x256xbf16, #tpu.memory_space<vmem>>, vector<32x256xbf16>,
    %c0_56 = arith.constant 0 : index
    %c0_57 = arith.constant 0 : index
    %c0_58 = arith.constant 0 : index
    %89 = vector.load %arg5[%c0_56, %c0_57, %c0_58] : memref<3x32x96xbf16, #tpu.memory_space<vmem>>, vector<1x32x96xbf16>
    %90 = vector.shape_cast %89 : vector<1x32x96xbf16> to vector<32x96xbf16>
    %c0_59 = arith.constant 0 : index
    %c0_60 = arith.constant 0 : index
    %91 = vector.load %arg12[%c0_59, %c0_60] : memref<288x256xbf16, #tpu.memory_space<vmem>>, vector<96x256xbf16>
    %cst_61 = arith.constant dense<0.000000e+00> : vector<32x256xf32>
    %92 = tpu.matmul %90, %91, %cst_61 {dimension_numbers = #tpu.dot_dimension_numbers<[1], [0], [0], [1], [0, 0, 1, 1], [], []>} : vector<32x96xbf16>, vector<96x256xbf16>, vector<32x256xf32> -> vector<32x256xf32>
    %c1_i32_62 = arith.constant 1 : i32
    %93 = tpu.dynamic_rotate %70 by %c1_i32_62 dim 1 : vector<32x256xf32>, i32 -> vector<32x256xf32>
    %c3_63 = arith.constant 3 : index
    %c0_64 = arith.constant 0 : index
    %94 = vector.load %arg2[%c3_63, %c0_64] : memref<9x256xf32, #tpu.memory_space<vmem>>, vector<1x256xf32>
    %95 = vector.broadcast %94 : vector<1x256xf32> to vector<32x256xf32>
    %96 = arith.mulf %93, %95 : vector<32x256xf32>
    %97 = arith.truncf %96 : vector<32x256xf32> to vector<32x256xbf16>
    %c96_65 = arith.constant 96 : index
    %c0_66 = arith.constant 0 : index
    %98 = vector.load %arg12[%c96_65, %c0_66] : memref<288x256xbf16, #tpu.memory_space<vmem>>, vector<32x256xbf16>
    tpu.vector_store %arg12[%c96_65, %c0_66], %97 {strides = array<i32>} : memref<288x256xbf16, #tpu.memory_space<vmem>>, vector<32x256xbf16>,
    %99 = arith.truncf %70 : vector<32x256xf32> to vector<32x256xbf16>
    %c128_67 = arith.constant 128 : index
    %c0_68 = arith.constant 0 : index
    %100 = vector.load %arg12[%c128_67, %c0_68] : memref<288x256xbf16, #tpu.memory_space<vmem>>, vector<32x256xbf16>
    tpu.vector_store %arg12[%c128_67, %c0_68], %99 {strides = array<i32>} : memref<288x256xbf16, #tpu.memory_space<vmem>>, vector<32x256xbf16>,
    %c255_i32_69 = arith.constant 255 : i32
    %101 = tpu.dynamic_rotate %70 by %c255_i32_69 dim 1 : vector<32x256xf32>, i32 -> vector<32x256xf32>
    %c5_70 = arith.constant 5 : index
    %c0_71 = arith.constant 0 : index
    %102 = vector.load %arg2[%c5_70, %c0_71] : memref<9x256xf32, #tpu.memory_space<vmem>>, vector<1x256xf32>
    %103 = vector.broadcast %102 : vector<1x256xf32> to vector<32x256xf32>
    %104 = arith.mulf %101, %103 : vector<32x256xf32>
    %105 = arith.truncf %104 : vector<32x256xf32> to vector<32x256xbf16>
    %c160_72 = arith.constant 160 : index
    %c0_73 = arith.constant 0 : index
    %106 = vector.load %arg12[%c160_72, %c0_73] : memref<288x256xbf16, #tpu.memory_space<vmem>>, vector<32x256xbf16>
    tpu.vector_store %arg12[%c160_72, %c0_73], %105 {strides = array<i32>} : memref<288x256xbf16, #tpu.memory_space<vmem>>, vector<32x256xbf16>,
    %c1_74 = arith.constant 1 : index
    %c0_75 = arith.constant 0 : index
    %c0_76 = arith.constant 0 : index
    %107 = vector.load %arg5[%c1_74, %c0_75, %c0_76] : memref<3x32x96xbf16, #tpu.memory_space<vmem>>, vector<1x32x96xbf16>
    %108 = vector.shape_cast %107 : vector<1x32x96xbf16> to vector<32x96xbf16>
    %c96_77 = arith.constant 96 : index
    %c0_78 = arith.constant 0 : index
    %109 = vector.load %arg12[%c96_77, %c0_78] : memref<288x256xbf16, #tpu.memory_space<vmem>>, vector<96x256xbf16>
    %cst_79 = arith.constant dense<0.000000e+00> : vector<32x256xf32>
    %110 = tpu.matmul %108, %109, %cst_79 {dimension_numbers = #tpu.dot_dimension_numbers<[1], [0], [0], [1], [0, 0, 1, 1], [], []>} : vector<32x96xbf16>, vector<96x256xbf16>, vector<32x256xf32> -> vector<32x256xf32>
    %111 = arith.addf %92, %110 : vector<32x256xf32>
    %c241_i32_80 = arith.constant 241 : i32
    %112 = tpu.dynamic_rotate %70 by %c241_i32_80 dim 1 : vector<32x256xf32>, i32 -> vector<32x256xf32>
    %c6_81 = arith.constant 6 : index
    %c0_82 = arith.constant 0 : index
    %113 = vector.load %arg2[%c6_81, %c0_82] : memref<9x256xf32, #tpu.memory_space<vmem>>, vector<1x256xf32>
    %114 = vector.broadcast %113 : vector<1x256xf32> to vector<32x256xf32>
    %115 = arith.mulf %112, %114 : vector<32x256xf32>
    %116 = arith.truncf %115 : vector<32x256xf32> to vector<32x256xbf16>
    %c192_83 = arith.constant 192 : index
    %c0_84 = arith.constant 0 : index
    %117 = vector.load %arg12[%c192_83, %c0_84] : memref<288x256xbf16, #tpu.memory_space<vmem>>, vector<32x256xbf16>
    tpu.vector_store %arg12[%c192_83, %c0_84], %116 {strides = array<i32>} : memref<288x256xbf16, #tpu.memory_space<vmem>>, vector<32x256xbf16>,
    %c240_i32_85 = arith.constant 240 : i32
    %118 = tpu.dynamic_rotate %70 by %c240_i32_85 dim 1 : vector<32x256xf32>, i32 -> vector<32x256xf32>
    %c7_86 = arith.constant 7 : index
    %c0_87 = arith.constant 0 : index
    %119 = vector.load %arg2[%c7_86, %c0_87] : memref<9x256xf32, #tpu.memory_space<vmem>>, vector<1x256xf32>
    %120 = vector.broadcast %119 : vector<1x256xf32> to vector<32x256xf32>
    %121 = arith.mulf %118, %120 : vector<32x256xf32>
    %122 = arith.truncf %121 : vector<32x256xf32> to vector<32x256xbf16>
    %c224_88 = arith.constant 224 : index
    %c0_89 = arith.constant 0 : index
    %123 = vector.load %arg12[%c224_88, %c0_89] : memref<288x256xbf16, #tpu.memory_space<vmem>>, vector<32x256xbf16>
    tpu.vector_store %arg12[%c224_88, %c0_89], %122 {strides = array<i32>} : memref<288x256xbf16, #tpu.memory_space<vmem>>, vector<32x256xbf16>,
    %c239_i32_90 = arith.constant 239 : i32
    %124 = tpu.dynamic_rotate %70 by %c239_i32_90 dim 1 : vector<32x256xf32>, i32 -> vector<32x256xf32>
    %c8_91 = arith.constant 8 : index
    %c0_92 = arith.constant 0 : index
    %125 = vector.load %arg2[%c8_91, %c0_92] : memref<9x256xf32, #tpu.memory_space<vmem>>, vector<1x256xf32>
    %126 = vector.broadcast %125 : vector<1x256xf32> to vector<32x256xf32>
    %127 = arith.mulf %124, %126 : vector<32x256xf32>
    %128 = arith.truncf %127 : vector<32x256xf32> to vector<32x256xbf16>
    %c256_93 = arith.constant 256 : index
    %c0_94 = arith.constant 0 : index
    %129 = vector.load %arg12[%c256_93, %c0_94] : memref<288x256xbf16, #tpu.memory_space<vmem>>, vector<32x256xbf16>
    tpu.vector_store %arg12[%c256_93, %c0_94], %128 {strides = array<i32>} : memref<288x256xbf16, #tpu.memory_space<vmem>>, vector<32x256xbf16>,
    %c2_95 = arith.constant 2 : index
    %c0_96 = arith.constant 0 : index
    %c0_97 = arith.constant 0 : index
    %130 = vector.load %arg5[%c2_95, %c0_96, %c0_97] : memref<3x32x96xbf16, #tpu.memory_space<vmem>>, vector<1x32x96xbf16>
    %131 = vector.shape_cast %130 : vector<1x32x96xbf16> to vector<32x96xbf16>
    %c192_98 = arith.constant 192 : index
    %c0_99 = arith.constant 0 : index
    %132 = vector.load %arg12[%c192_98, %c0_99] : memref<288x256xbf16, #tpu.memory_space<vmem>>, vector<96x256xbf16>
    %cst_100 = arith.constant dense<0.000000e+00> : vector<32x256xf32>
    %133 = tpu.matmul %131, %132, %cst_100 {dimension_numbers = #tpu.dot_dimension_numbers<[1], [0], [0], [1], [0, 0, 1, 1], [], []>} : vector<32x96xbf16>, vector<96x256xbf16>, vector<32x256xf32> -> vector<32x256xf32>
    %134 = arith.addf %111, %133 : vector<32x256xf32>
    %c0_101 = arith.constant 0 : index
    %c0_102 = arith.constant 0 : index
    %135 = vector.load %arg6[%c0_101, %c0_102] : memref<32x1xf32, #tpu.memory_space<vmem>>, vector<32x1xf32>
    %136 = vector.broadcast %135 : vector<32x1xf32> to vector<32x256xf32>
    %137 = arith.addf %134, %136 : vector<32x256xf32>
    %cst_103 = arith.constant dense<0.000000e+00> : vector<32xf32>
    %138 = vector.multi_reduction <add>, %137, %cst_103 [1] : vector<32x256xf32> to vector<32xf32>
    %139 = vector.shape_cast %138 : vector<32xf32> to vector<32x1xf32>
    %cst_104 = arith.constant 2.560000e+02 : f32
    %140 = vector.broadcast %cst_104 : f32 to vector<32x1xf32>
    %141 = arith.divf %139, %140 : vector<32x1xf32>
    %c0_105 = arith.constant 0 : index
    %c0_106 = arith.constant 0 : index
    %142 = vector.load %arg7[%c0_105, %c0_106] : memref<32x8xf32, #tpu.memory_space<vmem>>, vector<32x8xf32>
    %143 = vector.broadcast %141 : vector<32x1xf32> to vector<32x8xf32>
    %144 = arith.mulf %142, %143 : vector<32x8xf32>
    %cst_107 = arith.constant dense<0.000000e+00> : vector<8xf32>
    %145 = vector.multi_reduction <add>, %144, %cst_107 [0] : vector<32x8xf32> to vector<8xf32>
    %146 = vector.shape_cast %145 : vector<8xf32> to vector<1x8xf32>
    %c0_108 = arith.constant 0 : index
    %c0_109 = arith.constant 0 : index
    %147 = vector.load %arg8[%c0_108, %c0_109] : memref<1x8xf32, #tpu.memory_space<vmem>>, vector<1x8xf32>
    %148 = arith.addf %146, %147 : vector<1x8xf32>
    %cst_110 = arith.constant 0.000000e+00 : f32
    %149 = vector.broadcast %cst_110 : f32 to vector<1x8xf32>
    %150 = arith.maximumf %148, %149 : vector<1x8xf32>
    %c0_111 = arith.constant 0 : index
    %c0_112 = arith.constant 0 : index
    %151 = vector.load %arg9[%c0_111, %c0_112] : memref<32x8xf32, #tpu.memory_space<vmem>>, vector<32x8xf32>
    %152 = vector.broadcast %150 : vector<1x8xf32> to vector<32x8xf32>
    %153 = arith.mulf %151, %152 : vector<32x8xf32>
    %cst_113 = arith.constant dense<0.000000e+00> : vector<32xf32>
    %154 = vector.multi_reduction <add>, %153, %cst_113 [1] : vector<32x8xf32> to vector<32xf32>
    %155 = vector.shape_cast %154 : vector<32xf32> to vector<32x1xf32>
    %c0_114 = arith.constant 0 : index
    %c0_115 = arith.constant 0 : index
    %156 = vector.load %arg10[%c0_114, %c0_115] : memref<32x1xf32, #tpu.memory_space<vmem>>, vector<32x1xf32>
    %157 = arith.addf %155, %156 : vector<32x1xf32>
    %158 = arith.negf %157 : vector<32x1xf32>
    %159 = math.exp %158 : vector<32x1xf32>
    %cst_116 = arith.constant 1.000000e+00 : f32
    %160 = vector.broadcast %cst_116 : f32 to vector<32x1xf32>
    %161 = arith.addf %160, %159 : vector<32x1xf32>
    %162 = arith.divf %160, %161 : vector<32x1xf32>
    %cst_117 = arith.constant 1.000000e+00 : f32
    %163 = vector.broadcast %cst_117 : f32 to vector<32x1xf32>
    %164 = arith.mulf %162, %163 : vector<32x1xf32>
    %165 = vector.broadcast %164 : vector<32x1xf32> to vector<32x256xf32>
    %166 = arith.mulf %137, %165 : vector<32x256xf32>
    %167 = arith.addf %166, %1 : vector<32x256xf32>
    %c0_118 = arith.constant 0 : index
    %c0_119 = arith.constant 0 : index
    %c0_120 = arith.constant 0 : index
    %168 = vector.load %arg11[%c0_118, %c0_119, %c0_120] : memref<1x32x256xf32, #tpu.memory_space<vmem>>, vector<1x32x256xf32>
    %169 = vector.shape_cast %168 : vector<1x32x256xf32> to vector<32x256xf32>
    %170 = vector.shape_cast %167 : vector<32x256xf32> to vector<1x32x256xf32>
    tpu.vector_store %arg11[%c0_118, %c0_119, %c0_120], %170 {strides = array<i32>} : memref<1x32x256xf32, #tpu.memory_space<vmem>>, vector<1x32x256xf32>,
    return
  }
  func.func @transform_0(%arg0: i32) -> (i32, i32, i32) {
    %c0_i32 = arith.constant 0 : i32
    %c0_i32_0 = arith.constant 0 : i32
    %c0_i32_1 = arith.constant 0 : i32
    return %arg0, %c0_i32, %c0_i32_0 : i32, i32, i32
  }
  func.func @transform_1(%arg0: i32) -> (i32, i32) {
    %c0_i32 = arith.constant 0 : i32
    %c0_i32_0 = arith.constant 0 : i32
    %c0_i32_1 = arith.constant 0 : i32
    return %c0_i32, %c0_i32_0 : i32, i32
  }
  func.func @transform_2(%arg0: i32) -> (i32, i32, i32) {
    %c0_i32 = arith.constant 0 : i32
    %c0_i32_0 = arith.constant 0 : i32
    %c0_i32_1 = arith.constant 0 : i32
    %c0_i32_2 = arith.constant 0 : i32
    return %c0_i32, %c0_i32_0, %c0_i32_1 : i32, i32, i32
  }
  func.func @transform_3(%arg0: i32) -> (i32, i32) {
    %c0_i32 = arith.constant 0 : i32
    %c0_i32_0 = arith.constant 0 : i32
    %c0_i32_1 = arith.constant 0 : i32
    return %c0_i32, %c0_i32_0 : i32, i32
  }
  func.func @transform_4(%arg0: i32) -> (i32, i32, i32) {
    %c0_i32 = arith.constant 0 : i32
    %c0_i32_0 = arith.constant 0 : i32
    %c0_i32_1 = arith.constant 0 : i32
    %c0_i32_2 = arith.constant 0 : i32
    return %c0_i32, %c0_i32_0, %c0_i32_1 : i32, i32, i32
  }
  func.func @transform_5(%arg0: i32) -> (i32, i32) {
    %c0_i32 = arith.constant 0 : i32
    %c0_i32_0 = arith.constant 0 : i32
    %c0_i32_1 = arith.constant 0 : i32
    return %c0_i32, %c0_i32_0 : i32, i32
  }
  func.func @transform_6(%arg0: i32) -> (i32, i32) {
    %c0_i32 = arith.constant 0 : i32
    %c0_i32_0 = arith.constant 0 : i32
    %c0_i32_1 = arith.constant 0 : i32
    return %c0_i32, %c0_i32_0 : i32, i32
  }
  func.func @transform_7(%arg0: i32) -> (i32, i32) {
    %c0_i32 = arith.constant 0 : i32
    %c0_i32_0 = arith.constant 0 : i32
    %c0_i32_1 = arith.constant 0 : i32
    return %c0_i32, %c0_i32_0 : i32, i32
  }
  func.func @transform_8(%arg0: i32) -> (i32, i32) {
    %c0_i32 = arith.constant 0 : i32
    %c0_i32_0 = arith.constant 0 : i32
    %c0_i32_1 = arith.constant 0 : i32
    return %c0_i32, %c0_i32_0 : i32, i32
  }
  func.func @transform_9(%arg0: i32) -> (i32, i32) {
    %c0_i32 = arith.constant 0 : i32
    %c0_i32_0 = arith.constant 0 : i32
    %c0_i32_1 = arith.constant 0 : i32
    return %c0_i32, %c0_i32_0 : i32, i32
  }
  func.func @transform_10(%arg0: i32) -> (i32, i32, i32) {
    %c0_i32 = arith.constant 0 : i32
    %c0_i32_0 = arith.constant 0 : i32
    %c0_i32_1 = arith.constant 0 : i32
    return %arg0, %c0_i32, %c0_i32_0 : i32, i32, i32
  }
}

</mosaic_0001>

<bundles_post_ra>
// kernel: tpu_custom_call.1
= control target key start
LH: loop header
LB: loop body
LE: loop exit
PB: predicated region body
PF: predicated region fallthrough
CT: control target
= control target key end

     0   :  { %15 = vsyncpa [#allocation4], 0  ;;  %s4740_s0 = inlined_call_operand.vmem [shape: f32[2,32,256], index: 0, kind: input, shape index: {}]   ;;  %s4741_s1 = inlined_call_operand.hbm [shape: f32[9,256], index: 1, kind: input, shape index: {}]   ;;  %s4742_s2 = inlined_call_operand.vmem [shape: bf16[3,32,96], index: 2, kind: input, shape index: {}]   ;;  %s4743_s3 = inlined_call_operand.vmem [shape: f32[32,1], index: 3, kind: input, shape index: {}]   ;;  %s4744_s4 = inlined_call_operand.hbm [shape: bf16[3,32,96], index: 4, kind: input, shape index: {}]   ;;  %s4745_s5 = inlined_call_operand.vmem [shape: f32[32,1], index: 5, kind: input, shape index: {}]   ;;  %s4746_s6 = inlined_call_operand.vmem [shape: f32[32,8], index: 6, kind: input, shape index: {}]   ;;  %s4747_s7 = inlined_call_operand.hbm [shape: f32[1,8], index: 7, kind: input, shape index: {}]   ;;  %s4748_s8 = inlined_call_operand.vmem [shape: f32[32,8], index: 8, kind: input, shape index: {}]   ;;  %s4749_s9 = inlined_call_operand.vmem [shape: f32[32,1], index: 9, kind: input, shape index: {}]   ;;  %s4750_s10 = inlined_call_operand.hbm [shape: f32[2,32,256], index: 10, kind: output, shape index: {}]  }
   0x1   :  { %16 = vsyncpa [#allocation7], 0 }
   0x2   :  { %17 = vsyncpa [#allocation5], 0 }
   0x3   :  { %19 = vsyncpa [#allocation5 + $0x1], 0  ;;  %s3533_s13 = smov 0   ;;  %s3535_s14 = smov 0  }
   0x4   :  { %s3537_s15 = smov 0   ;;  %s3539_s16 = smov 0  }
   0x5 LB: > { %4773 = sst [smem:[#allocation13_spill]] %s3454_s15  ;;  %s3554_s17 = sadd.s32 4294967295, %s3458_s16   ;;  %s3458_s16 = sphi %s3539_s16, %s4831_s16   ;;  %s3454_s15 = sphi %s3537_s15, %s4828_s15   ;;  %s3450_s14 = sphi %s3535_s14, %s4830_s14   ;;  %s3446_s13 = sphi %s3533_s13, %s4829_s13  }
   0x6   : > { %s2846_s18 = sadd.s32 4294967294, %s3458_s16   ;;  %s3558_s19 = sadd.s32 1, %s3458_s16  }
   0x7   : > { %s247_s20 = sadd.s32 1, %s3454_s15  ;;  %s244_s21 = ssub.s32 %s3458_s16, %s3558_s19 }
   0x8   : > { %p257_p0 = scmp.ne.s32.totalorder %s3454_s15, %s3450_s14  ;;  %p245_p1 = scmp.eq.s32.totalorder %s244_s21, 0 }
   0x9   : > { %p258_p2 = scmp.eq.s32.totalorder %s3554_s17, 1  ;;  %p263_p3 = scmp.ne.s32.totalorder %s3450_s14, %s3446_s13 }
   0xa   : > { %p264_p4 = scmp.eq.s32.totalorder %s2846_s18, 1  ;;  %p2847_p7 = scmp.ge.s32.totalorder %s3458_s16, 1 }
   0xb   : > { %s3569_s22 = scalar_select %p245_p1, %s3454_s15, %s247_s20  }
   0xc   : > { %p3571_p5 = por %p258_p2, %p257_p0  ;;  %p3575_p6 = por %p264_p4, %p263_p3 }
   0xd   : > { %4774 = sst [smem:[#allocation14_spill]] %s3569_s22  ;;  %p271_p8 = scmp.lt.s32.totalorder %s3458_s16, 3 }
   0xe   : > { %s4776_s24 = scalar_select %p3575_p6, 1, 0 }
   0xf   : > { %p4751_p9 = scmp.eq.s32.totalorder %s3554_s17, 0  ;;  %p3582_p10 = pnand %p2847_p7, %p271_p8 }
  0x10   : > { %s3460_s26 = smov [#allocation6]   ;;  %s3461_s29 = smov [#allocation3]  }
  0x11   : > { %s302_s27 = sshll.u32 %s3460_s26, 4  ;;  %p3204_p11 = pneg %p3582_p10  ;;  %s303_s27 = int_to_ptr.vmem [resolvable:$true] %s302_s27 }
  0x12   : > { %s283_s30 = sshll.u32 %s3461_s29, 4  ;;  %s3323_s11 = scalar_lea.vmem %s303_s27, 768  ;;  %s284_s30 = int_to_ptr.vmem [resolvable:$true] %s283_s30 }
  0x13   : > { %p3590_p12 = pnand %p4751_p9, %p3204_p11  ;;  %p3324_p0 = scmp.ne.s32.totalorder %s303_s27, %s3323_s11 }
  0x14   : > { %p3331_p3 = scmp.lt.s32.totalorder %s303_s27, %s303_s27  ;;  %p3332_p4 = scmp.lt.s32.totalorder %s3323_s11, %s3323_s11 }
  0x15   : > { %p3314_p13 = pneg %p3590_p12 }
  0x16   : > { %p3333_p7 = por %p3332_p4, %p3331_p3 }
  0x17   : > { %p3326_p1 = pnand %p3324_p0, %p3314_p13 }
  0x19   : > { %p3327_p2 = pneg %p3326_p1 }
  0x1b   : > { %p3334_p8 = pnand %p3333_p7, %p3327_p2 }
  0x1d   : > { %3337 = shalt.err (!%p3334_p8)
}
  0x1e   : > { %s3462_s12 = smov 64   ;;  %s3463_s18 = smov 4  }
  0x1f   : > { %3210 = dma.hbm_to_vmem [thread:$0]  (!%p3590_p12), %s4744_s4, 768, %s303_s27, [#allocation7], %s3462_s12, %s3462_s12, %s3463_s18  }
  0x20   : > { %s3349_s26 = scalar_lea.vmem %s284_s30, 512  ;;  %p3357_p9 = scmp.lt.s32.totalorder %s284_s30, %s284_s30 }
  0x21   : > { %p3350_p11 = scmp.ne.s32.totalorder %s284_s30, %s3349_s26  ;;  %p3358_p6 = scmp.lt.s32.totalorder %s3349_s26, %s3349_s26 }
  0x23   : > { %p3352_p0 = pnand %p3350_p11, %p3314_p13  ;;  %p3359_p3 = por %p3358_p6, %p3357_p9 }
  0x25   : > { %p3353_p1 = pneg %p3352_p0 }
  0x27   : > { %p3360_p2 = pnand %p3359_p3, %p3353_p1 }
  0x29   : > { %3363 = shalt.err (!%p3360_p2)
}
  0x2a   : > { %s3464_s29 = smov 256   ;;  %s3465_s11 = smov 16  }
  0x2b   : > { %3207 = dma.hbm_to_vmem [thread:$0]  (!%p3590_p12), %s4741_s1, 512, %s284_s30, [#allocation4], %s3464_s29, %s3464_s29, %s3465_s11  }
  0x2c   : > { %s3466_s27 = smov [#allocation8]  }
  0x2d   : > { %s322_s12 = sshll.u32 %s3466_s27, 4  ;;  %s323_s12 = int_to_ptr.vmem [resolvable:$true] %s322_s12 }
  0x2e   : > { %s3375_s18 = scalar_lea.vmem %s323_s12, 16  ;;  %s3382_s20 = scalar_lea.vmem %s323_s12, 32 }
  0x2f   : > { %p3376_p4 = scmp.ne.s32.totalorder %s323_s12, %s3375_s18  ;;  %p3383_p9 = scmp.lt.s32.totalorder %s323_s12, %s323_s12 }
  0x30   : > { %p3384_p8 = scmp.lt.s32.totalorder %s3382_s20, %s3375_s18 }
  0x31   : > { %p3378_p7 = pnand %p3376_p4, %p3314_p13 }
  0x32   : > { %p3385_p11 = por %p3384_p8, %p3383_p9 }
  0x33   : > { %p3379_p6 = pneg %p3378_p7 }
  0x35   : > { %p3386_p0 = pnand %p3385_p11, %p3379_p6 }
  0x37   : > { %3389 = shalt.err (!%p3386_p0)
}
  0x38   : > { %3213 = dma.hbm_to_vmem [thread:$0]  (!%p3590_p12), %s4747_s7, 16, %s323_s12, [#allocation7]  }
  0x39   : > { %349 = sbr.rel (%p3582_p10) target bundleno = 1478 (0x5c6), region = 60 }
  0x3e   : > { %p4779_p1 = scmp.eq.s32.totalorder %s3554_s17, 0 }
  0x40   : > { %3433 = dma.done.wait (%p4779_p1), [#allocation4], 512   ;;  %p4780_p13 = pmov %p4779_p1 }
  0x41   : > { %p4781_p3 = pmov %p4779_p1 }
  0x42   : > { %3435 = vsyncadd (%p4780_p13), [#allocation4], 4294966784 }
  0x43   : > { %3437 = dma.done.wait (%p4781_p3), [#allocation7], 784   ;;  %p4782_p2 = pmov %p4779_p1 }
  0x44   : > { %p395_p4 = scmp.lt.s32.totalorder %s3554_s17, 1  ;;  %s3467_s29 = smov 127   ;;  %v4757_v8 = vmov 0   ;;  %v425_v9 = vlaneseq  ;;  %v776_v14 = vld [vmem:[#allocation3 + $0x5] ss:$8 sm:$0x3] }
  0x45   : > { %3439 = vsyncadd (%p4782_p2), [#allocation7], 4294966512  ;;  %s3468_s11 = smov 1   ;;  %s3469_s27 = smov 15   ;;  %950 = vmatprep.mubr.bf16.mxu0 %v4757_v8  ;;  %1079 = vmatprep.mubr.bf16.mxu1 %v4757_v8  ;;  %v1479_v44 = vld [vmem:[%s4743_s3 + $0x18] sm:$0xff]  ;;  %v1478_v45 = vld [vmem:[%s4743_s3 + $0x10] sm:$0xff] }
  0x46   : > { %s396_s22 = scalar_select %p395_p4, %s3554_s17, 1  ;;  %3275 = vset.pattern.permute.xlu1 %v4757_v8  ;;  %3274 = vset.pattern.permute.xlu0 %v4757_v8  ;;  %v439_v10 = vshrl.u32 %v425_v9, 7  ;;  %v3777_v11 = vand.u32 127, %v425_v9  ;;  %v674_v43 = vld [vmem:[#allocation3 + $0x3] ss:$8 sm:$0x3] }
  0x47   : > { %s3471_s12 = smov 111   ;;  %s3472_s18 = smov 16   ;;  %v1476_v51 = vld [vmem:[%s4743_s3] sm:$0xff]  ;;  %v1477_v53 = vld [vmem:[%s4743_s3 + $0x8] sm:$0xff]  ;;  %vm911_vm3 = vcmask 785408   ;;  %vm2622_vm9 = vcmask 64512  }
  0x48   : > { %s3044_s28 = sshll.u32 %s396_s22, 6  ;;  %s3473_s20 = smov 112   ;;  %v3779_v12 = vsub.s32 1, %v439_v10  ;;  %v3785_v13 = vsub.s32 0, %v439_v10  ;;  %vm766_vm0 = vcmp.lt.s32.totalorder %v3777_v11, 127  ;;  %vm664_vm1 = vcmp.lt.s32.totalorder %v3777_v11, 1 }
  0x49   : > { %s3635_s26 = scalar_lea.vmem %s4740_s0, %s3044_s28  ;;  %s4755_s21 = smov 17   ;;  %vm574_vm2 = vcmp.lt.s32.totalorder %v3777_v11, 15  ;;  %vm1264_vm4 = vcmp.lt.s32.totalorder %v3777_v11, 111  ;;  %vm500_vm5 = vcmp.lt.s32.totalorder %v3777_v11, 16  ;;  %vm1190_vm6 = vcmp.lt.s32.totalorder %v3777_v11, 112 }
  0x4a   : > { %v3638_v0 = vld [vmem:[%s3635_s26 + $0x28] sm:$0xff]  ;;  %v3641_v1 = vld [vmem:[%s3635_s26 + $0x20] sm:$0xff]  ;;  %v3648_v2 = vld [vmem:[%s3635_s26 + $0x38] sm:$0xff]  ;;  %s4753_s15 = smov 113   ;;  %v785_v17 = vrot.slane %v776_v14, %v3779_v12  ;;  %v781_v19 = vrot.slane %v776_v14, %v3785_v13  ;;  %v683_v52 = vrot.slane %v674_v43, %v3779_v12  ;;  %v679_v55 = vrot.slane %v674_v43, %v3785_v13  ;;  %s3476_s28 = smov [#allocation9]  }
  0x4b   : > { %762 = vrot.lane.b32.xlu1 %v3638_v0, %s3467_s29  ;;  %754 = vrot.lane.b32.xlu0 %v3641_v1, %s3467_s29  ;;  %v3651_v3 = vld [vmem:[%s3635_s26 + $0x30] sm:$0xff]  ;;  %v3661_v5 = vld [vmem:[%s3635_s26] sm:$0xff]  ;;  %v3125_v50 = vpack.c.bf16 %v3648_v2, %v3638_v0  ;;  %vm427_vm7 = vcmp.lt.s32.totalorder %v3777_v11, 17  ;;  %vm1116_vm8 = vcmp.lt.s32.totalorder %v3777_v11, 113  ;;  %v3286_v11 = vld [vmem:[#allocation6 + $0x8] sm:$0xff]  }
  0x4c   : > { %v3658_v4 = vld [vmem:[%s3635_s26 + $0x10] sm:$0xff]  ;;  %v3664_v6 = vld [vmem:[%s3635_s26 + $0x18] sm:$0xff]  ;;  %v3667_v7 = vld [vmem:[%s3635_s26 + $0x8] sm:$0xff]  ;;  %v3124_v54 = vpack.c.bf16 %v3651_v3, %v3641_v1 }
  0x4d   : > { %v3123_v58 = vpack.c.bf16 %v3664_v6, %v3667_v7 }
  0x4f   : > { %764 = vrot.lane.b32.xlu1 %v3648_v2, %s3467_s29  ;;  %756 = vrot.lane.b32.xlu0 %v3651_v3, %s3467_s29 }
  0x53   : > { %752 = vrot.lane.b32.xlu1 %v3658_v4, %s3467_s29  ;;  %750 = vrot.lane.b32.xlu0 %v3661_v5, %s3467_s29 }
  0x57   : > { %760 = vrot.lane.b32.xlu1 %v3664_v6, %s3467_s29  ;;  %758 = vrot.lane.b32.xlu0 %v3667_v7, %s3467_s29 }
  0x5b   : > { %654 = vrot.lane.b32.xlu1 %v3651_v3, %s3468_s11  ;;  %652 = vrot.lane.b32.xlu0 %v3641_v1, %s3468_s11 }
  0x5f   : > { %662 = vrot.lane.b32.xlu1 %v3648_v2, %s3468_s11  ;;  %660 = vrot.lane.b32.xlu0 %v3638_v0, %s3468_s11 }
  0x63   : > { %650 = vrot.lane.b32.xlu1 %v3658_v4, %s3468_s11  ;;  %648 = vrot.lane.b32.xlu0 %v3661_v5, %s3468_s11 }
  0x67   : > { %658 = vrot.lane.b32.xlu1 %v3664_v6, %s3468_s11  ;;  %656 = vrot.lane.b32.xlu0 %v3667_v7, %s3468_s11 }
  0x6b   : > { %564 = vrot.lane.b32.xlu1 %v3651_v3, %s3469_s27  ;;  %562 = vrot.lane.b32.xlu0 %v3641_v1, %s3469_s27 }
  0x6f   : > { %572 = vrot.lane.b32.xlu1 %v3648_v2, %s3469_s27  ;;  %570 = vrot.lane.b32.xlu0 %v3638_v0, %s3469_s27 }
  0x73   : > { %1254 = vrot.lane.b32.xlu1 %v3651_v3, %s3471_s12  ;;  %1252 = vrot.lane.b32.xlu0 %v3641_v1, %s3471_s12 }
  0x77   : > { %1262 = vrot.lane.b32.xlu1 %v3648_v2, %s3471_s12  ;;  %1260 = vrot.lane.b32.xlu0 %v3638_v0, %s3471_s12 }
  0x7b   : > { %560 = vrot.lane.b32.xlu1 %v3658_v4, %s3469_s27  ;;  %558 = vrot.lane.b32.xlu0 %v3661_v5, %s3469_s27 }
  0x7f   : > { %568 = vrot.lane.b32.xlu1 %v3664_v6, %s3469_s27  ;;  %566 = vrot.lane.b32.xlu0 %v3667_v7, %s3469_s27 }
  0x83   : > { %1250 = vrot.lane.b32.xlu1 %v3658_v4, %s3471_s12  ;;  %1248 = vrot.lane.b32.xlu0 %v3661_v5, %s3471_s12 }
  0x87   : > { %1258 = vrot.lane.b32.xlu1 %v3664_v6, %s3471_s12  ;;  %1256 = vrot.lane.b32.xlu0 %v3667_v7, %s3471_s12 }
  0x8b   : > { %490 = vrot.lane.b32.xlu1 %v3651_v3, %s3472_s18  ;;  %488 = vrot.lane.b32.xlu0 %v3641_v1, %s3472_s18 }
  0x8f   : > { %498 = vrot.lane.b32.xlu1 %v3648_v2, %s3472_s18  ;;  %496 = vrot.lane.b32.xlu0 %v3638_v0, %s3472_s18 }
  0x93   : > { %1180 = vrot.lane.b32.xlu1 %v3651_v3, %s3473_s20  ;;  %1178 = vrot.lane.b32.xlu0 %v3641_v1, %s3473_s20 }
  0x97   : > { %1188 = vrot.lane.b32.xlu1 %v3648_v2, %s3473_s20  ;;  %1186 = vrot.lane.b32.xlu0 %v3638_v0, %s3473_s20 }
  0x9b   : > { %486 = vrot.lane.b32.xlu1 %v3658_v4, %s3472_s18  ;;  %484 = vrot.lane.b32.xlu0 %v3661_v5, %s3472_s18 }
  0x9f   : > { %494 = vrot.lane.b32.xlu1 %v3664_v6, %s3472_s18  ;;  %492 = vrot.lane.b32.xlu0 %v3667_v7, %s3472_s18 }
  0xa3   : > { %1176 = vrot.lane.b32.xlu1 %v3658_v4, %s3473_s20  ;;  %1174 = vrot.lane.b32.xlu0 %v3661_v5, %s3473_s20 }
  0xa7   : > { %1184 = vrot.lane.b32.xlu1 %v3664_v6, %s3473_s20  ;;  %1182 = vrot.lane.b32.xlu0 %v3667_v7, %s3473_s20 }
  0xab   : > { %415 = vrot.lane.b32.xlu1 %v3651_v3, %s4755_s21  ;;  %413 = vrot.lane.b32.xlu0 %v3641_v1, %s4755_s21 }
  0xaf   : > { %423 = vrot.lane.b32.xlu1 %v3648_v2, %s4755_s21  ;;  %421 = vrot.lane.b32.xlu0 %v3638_v0, %s4755_s21 }
  0xb3   : > { %1106 = vrot.lane.b32.xlu1 %v3651_v3, %s4753_s15  ;;  %1104 = vrot.lane.b32.xlu0 %v3641_v1, %s4753_s15  ;;  %v3122_v1 = vpack.c.bf16 %v3658_v4, %v3661_v5 }
  0xb7   : > { %1114 = vrot.lane.b32.xlu1 %v3648_v2, %s4753_s15  ;;  %1112 = vrot.lane.b32.xlu0 %v3638_v0, %s4753_s15 }
  0xbb   : > { %411 = vrot.lane.b32.xlu1 %v3658_v4, %s4755_s21  ;;  %409 = vrot.lane.b32.xlu0 %v3661_v5, %s4755_s21 }
  0xbd   : > { %v763_v15 = vpop.permute.xlu1 %762  ;;  %v755_v16 = vpop.permute.xlu0 %754 }
  0xbe   : > { %v773_v18 = vsel %vm766_vm0, %v763_v15, %v755_v16  ;;  %v769_v20 = vsel %vm766_vm0, %v755_v16, %v763_v15 }
  0xbf   : > { %419 = vrot.lane.b32.xlu1 %v3664_v6, %s4755_s21  ;;  %417 = vrot.lane.b32.xlu0 %v3667_v7, %s4755_s21  ;;  %v793_v25 = vmul.f32 %v785_v17, %v773_v18  ;;  %v792_v27 = vmul.f32 %v781_v19, %v769_v20  ;;  %s4783_s21 = smov 17  }
  0xc1   : > { %v765_v21 = vpop.permute.xlu1 %764  ;;  %v757_v22 = vpop.permute.xlu0 %756 }
  0xc2   : > { %v770_v23 = vsel %vm766_vm0, %v757_v22, %v765_v21  ;;  %v774_v24 = vsel %vm766_vm0, %v765_v21, %v757_v22  ;;  %v584_v22 = vld [vmem:[#allocation3 + $0x2] ss:$8 sm:$0x3] }
  0xc3   : > { %1102 = vrot.lane.b32.xlu1 %v3658_v4, %s4753_s15  ;;  %1100 = vrot.lane.b32.xlu0 %v3661_v5, %s4753_s15  ;;  %v795_v26 = vmul.f32 %v785_v17, %v774_v24  ;;  %v794_v28 = vmul.f32 %v781_v19, %v770_v23 }
  0xc5   : > { %v753_v29 = vpop.permute.xlu1 %752  ;;  %v751_v30 = vpop.permute.xlu0 %750  ;;  %v3129_v31 = vpack.c.bf16 %v795_v26, %v793_v25  ;;  %v3128_v32 = vpack.c.bf16 %v794_v28, %v792_v27  ;;  %v593_v27 = vrot.slane %v584_v22, %v3779_v12  ;;  %v589_v28 = vrot.slane %v584_v22, %v3785_v13 }
  0xc7   : > { %922 = vmatprep.subr.bf16.mxu0 %v3129_v31  ;;  %1110 = vrot.lane.b32.xlu1 %v3664_v6, %s4753_s15 }
  0xc8   : > { %1108 = vrot.lane.b32.xlu0 %v3667_v7, %s4753_s15  ;;  %923 = vmatpush1.bf16.msra.mxu0 %v3128_v32  ;;  %s4784_s15 = smov 113  }
  0xc9   : > { %v761_v33 = vpop.permute.xlu1 %760  ;;  %v759_v34 = vpop.permute.xlu0 %758 }
  0xca   : > { %v768_v35 = vsel %vm766_vm0, %v753_v29, %v761_v33  ;;  %v772_v36 = vsel %vm766_vm0, %v761_v33, %v753_v29  ;;  %v767_v37 = vsel %vm766_vm0, %v751_v30, %v759_v34  ;;  %v771_v38 = vsel %vm766_vm0, %v759_v34, %v751_v30  ;;  %v3276_v29 = vld [vmem:[%s4742_s2 + $0x10] sm:$0xff]  }
  0xcb   : > { %v790_v39 = vmul.f32 %v781_v19, %v768_v35  ;;  %v791_v40 = vmul.f32 %v785_v17, %v772_v36  ;;  %v788_v41 = vmul.f32 %v781_v19, %v767_v37  ;;  %v789_v42 = vmul.f32 %v785_v17, %v771_v38  ;;  %1497 = vperm.xlu1 %3275, %v1479_v44  }
  0xcc   : > { %1492 = vperm.xlu0 %3274, %v1478_v45  }
  0xcd   : > { %v655_v46 = vpop.permute.xlu1 %654  ;;  %v653_v47 = vpop.permute.xlu0 %652  ;;  %v3127_v48 = vpack.c.bf16 %v791_v40, %v789_v42  ;;  %v3126_v49 = vpack.c.bf16 %v790_v39, %v788_v41  ;;  %v1274_v40 = vld [vmem:[#allocation3 + $0x10] ss:$8 sm:$0x3] }
  0xce   : > { %v1279_v45 = vrot.slane %v1274_v40, %v3785_v13 }
  0xcf   : > { %924 = vmatprep.subr.bf16.mxu0 %v3127_v48  ;;  %1482 = vperm.xlu1 %3275, %v1476_v51  }
  0xd0   : > { %925 = vmatpush1.bf16.msra.mxu0 %v3126_v49  ;;  %1487 = vperm.xlu0 %3274, %v1477_v53  }
  0xd1   : > { %v663_v56 = vpop.permute.xlu1 %662  ;;  %v661_v57 = vpop.permute.xlu0 %660  ;;  %926 = vmatprep.subr.bf16.mxu0 %v3125_v50 }
  0xd2   : > { %v668_v59 = vsel %vm664_vm1, %v655_v46, %v663_v56  ;;  %v672_v60 = vsel %vm664_vm1, %v663_v56, %v655_v46  ;;  %v667_v61 = vsel %vm664_vm1, %v653_v47, %v661_v57  ;;  %v671_v62 = vsel %vm664_vm1, %v661_v57, %v653_v47  ;;  %v3277_v47 = vld [vmem:[%s4742_s2 + $0x18] sm:$0xff]  }
  0xd3   : > { %v693_v63 = vmul.f32 %v683_v52, %v668_v59  ;;  %v691_v0 = vmul.f32 %v683_v52, %v667_v61  ;;  %v692_v2 = vmul.f32 %v679_v55, %v672_v60  ;;  %v690_v3 = vmul.f32 %v679_v55, %v671_v62 }
  0xd4   : > { %927 = vmatpush1.bf16.msra.mxu0 %v3124_v54  ;;  %v1283_v46 = vrot.slane %v1274_v40, %v3779_v12 }
  0xd5   : > { %v651_v6 = vpop.permute.xlu1 %650  ;;  %v649_v7 = vpop.permute.xlu0 %648  ;;  %928 = vmatprep.subr.bf16.mxu0 %v3123_v58  ;;  %v3121_v9 = vpack.c.bf16 %v693_v63, %v691_v0  ;;  %v3120_v15 = vpack.c.bf16 %v692_v2, %v690_v3 }
  0xd8   : > { %929 = vmatpush1.bf16.msra.mxu0 %v3122_v1 }
  0xd9   : > { %v659_v10 = vpop.permute.xlu1 %658  ;;  %v657_v14 = vpop.permute.xlu0 %656  ;;  %930 = vmatprep.subr.bf16.mxu0 %v3121_v9 }
  0xda   : > { %v666_v16 = vsel %vm664_vm1, %v651_v6, %v659_v10  ;;  %v670_v17 = vsel %vm664_vm1, %v659_v10, %v651_v6  ;;  %v665_v4 = vsel %vm664_vm1, %v649_v7, %v657_v14  ;;  %v669_v5 = vsel %vm664_vm1, %v657_v14, %v649_v7 }
  0xdb   : > { %v688_v18 = vmul.f32 %v679_v55, %v670_v17  ;;  %v689_v19 = vmul.f32 %v683_v52, %v666_v16  ;;  %v686_v20 = vmul.f32 %v679_v55, %v669_v5  ;;  %v687_v21 = vmul.f32 %v683_v52, %v665_v4 }
  0xdc   : > { %931 = vmatpush1.bf16.msra.mxu0 %v3120_v15 }
  0xdd   : > { %v565_v23 = vpop.permute.xlu1 %564  ;;  %v563_v24 = vpop.permute.xlu0 %562  ;;  %v3119_v25 = vpack.c.bf16 %v689_v19, %v687_v21  ;;  %v3118_v26 = vpack.c.bf16 %v688_v18, %v686_v20 }
  0xdf   : > { %932 = vmatprep.subr.bf16.mxu0 %v3119_v25 }
  0xe0   : > { %933 = vmatpush1.bf16.msra.mxu0 %v3118_v26  ;;  %v510_v26 = vld [vmem:[#allocation3 + $0x1] ss:$8 sm:$0x3] }
  0xe1   : > { %v573_v30 = vpop.permute.xlu1 %572  ;;  %v571_v31 = vpop.permute.xlu0 %570 }
  0xe2   : > { %v582_v32 = vsel %vm574_vm2, %v573_v30, %v565_v23  ;;  %v581_v33 = vsel %vm574_vm2, %v571_v31, %v563_v24  ;;  %v577_v34 = vsel %vm574_vm2, %v563_v24, %v571_v31  ;;  %v578_v35 = vsel %vm574_vm2, %v565_v23, %v573_v30 }
  0xe3   : > { %v601_v36 = vmul.f32 %v593_v27, %v577_v34  ;;  %v603_v37 = vmul.f32 %v593_v27, %v578_v35  ;;  %v600_v38 = vmul.f32 %v589_v28, %v581_v33  ;;  %v602_v39 = vmul.f32 %v589_v28, %v582_v32  ;;  %2901 = vmatmul.mubr.msk.bf16.vlgmr.msra.gmra.mxu0 %vm911_vm3, %v3276_v29 }
  0xe4   : > { %960 = vmatprep.mubr.bf16.mxu0 %v4757_v8  ;;  %v515_v31 = vrot.slane %v510_v26, %v3785_v13  ;;  %v519_v32 = vrot.slane %v510_v26, %v3779_v12 }
  0xe5   : > { %v1255_v41 = vpop.permute.xlu1 %1254  ;;  %v1253_v42 = vpop.permute.xlu0 %1252  ;;  %v3141_v43 = vpack.c.bf16 %v603_v37, %v601_v36  ;;  %v3140_v44 = vpack.c.bf16 %v602_v39, %v600_v38 }
  0xe7   : > { %1051 = vmatprep.subr.bf16.mxu1 %v3141_v43  ;;  %v1200_v43 = vld [vmem:[#allocation3 + $0x7] ss:$8 sm:$0x3] }
  0xe8   : > { %1052 = vmatpush1.bf16.msra.mxu1 %v3140_v44 }
  0xe9   : > { %v1263_v48 = vpop.permute.xlu1 %1262  ;;  %v1261_v49 = vpop.permute.xlu0 %1260 }
  0xea   : > { %v1268_v50 = vsel %vm1264_vm4, %v1255_v41, %v1263_v48  ;;  %v1272_v51 = vsel %vm1264_vm4, %v1263_v48, %v1255_v41  ;;  %v1267_v52 = vsel %vm1264_vm4, %v1253_v42, %v1261_v49  ;;  %v1271_v53 = vsel %vm1264_vm4, %v1261_v49, %v1253_v42 }
  0xeb   : > { %v1292_v54 = vmul.f32 %v1279_v45, %v1268_v50  ;;  %v1293_v55 = vmul.f32 %v1283_v46, %v1272_v51  ;;  %v1290_v56 = vmul.f32 %v1279_v45, %v1267_v52  ;;  %v1291_v57 = vmul.f32 %v1283_v46, %v1271_v53  ;;  %2902 = vmatmul.mubr.msk.bf16.gmra.mxu0 %vm911_vm3, %v3277_v47 }
  0xec   : > { %1447 = vmatprep.mubr.bf16.mxu0 %v4757_v8  ;;  %v1205_v48 = vrot.slane %v1200_v43, %v3785_v13  ;;  %v1209_v49 = vrot.slane %v1200_v43, %v3779_v12 }
  0xed   : > { %v3152_v58 = vpack.c.bf16 %v1292_v54, %v1290_v56  ;;  %v561_v59 = vpop.permute.xlu1 %560  ;;  %v559_v60 = vpop.permute.xlu0 %558  ;;  %v3153_v61 = vpack.c.bf16 %v1293_v55, %v1291_v57 }
  0xef   : > { %1419 = vmatprep.subr.bf16.mxu0 %v3153_v61 }
  0xf0   : > { %1420 = vmatpush1.bf16.msra.mxu0 %v3152_v58 }
  0xf1   : > { %v569_v62 = vpop.permute.xlu1 %568  ;;  %v567_v63 = vpop.permute.xlu0 %566 }
  0xf2   : > { %v576_v0 = vsel %vm574_vm2, %v561_v59, %v569_v62  ;;  %v580_v1 = vsel %vm574_vm2, %v569_v62, %v561_v59  ;;  %v575_v2 = vsel %vm574_vm2, %v559_v60, %v567_v63  ;;  %v579_v3 = vsel %vm574_vm2, %v567_v63, %v559_v60 }
  0xf3   : > { %v598_v6 = vmul.f32 %v589_v28, %v580_v1  ;;  %v599_v7 = vmul.f32 %v593_v27, %v576_v0  ;;  %v596_v9 = vmul.f32 %v589_v28, %v579_v3  ;;  %v597_v10 = vmul.f32 %v593_v27, %v575_v2 }
  0xf5   : > { %v1251_v14 = vpop.permute.xlu1 %1250  ;;  %v1249_v15 = vpop.permute.xlu0 %1248  ;;  %v3139_v16 = vpack.c.bf16 %v599_v7, %v597_v10  ;;  %v3138_v17 = vpack.c.bf16 %v598_v6, %v596_v9 }
  0xf7   : > { %1053 = vmatprep.subr.bf16.mxu1 %v3139_v16 }
  0xf8   : > { %1054 = vmatpush1.bf16.msra.mxu1 %v3138_v17 }
  0xf9   : > { %v1259_v4 = vpop.permute.xlu1 %1258  ;;  %v1257_v5 = vpop.permute.xlu0 %1256 }
  0xfa   : > { %v1266_v18 = vsel %vm1264_vm4, %v1251_v14, %v1259_v4  ;;  %v1270_v19 = vsel %vm1264_vm4, %v1259_v4, %v1251_v14  ;;  %v1265_v20 = vsel %vm1264_vm4, %v1249_v15, %v1257_v5  ;;  %v1269_v21 = vsel %vm1264_vm4, %v1257_v5, %v1249_v15 }
  0xfb   : > { %v1288_v22 = vmul.f32 %v1279_v45, %v1266_v18  ;;  %v1289_v23 = vmul.f32 %v1283_v46, %v1270_v19  ;;  %v1286_v24 = vmul.f32 %v1279_v45, %v1265_v20  ;;  %v1287_v25 = vmul.f32 %v1283_v46, %v1269_v21 }
  0xfd   : > { %v3150_v27 = vpack.c.bf16 %v1288_v22, %v1286_v24  ;;  %v491_v28 = vpop.permute.xlu1 %490  ;;  %v489_v29 = vpop.permute.xlu0 %488  ;;  %v3151_v30 = vpack.c.bf16 %v1289_v23, %v1287_v25 }
  0xff   : > { %1421 = vmatprep.subr.bf16.mxu0 %v3151_v30 }
 0x100   : > { %1422 = vmatpush1.bf16.msra.mxu0 %v3150_v27 }
 0x101   : > { %v499_v33 = vpop.permute.xlu1 %498  ;;  %v497_v34 = vpop.permute.xlu0 %496 }
 0x102   : > { %v504_v35 = vsel %vm500_vm5, %v491_v28, %v499_v33  ;;  %v508_v36 = vsel %vm500_vm5, %v499_v33, %v491_v28  ;;  %v503_v37 = vsel %vm500_vm5, %v489_v29, %v497_v34  ;;  %v507_v38 = vsel %vm500_vm5, %v497_v34, %v489_v29  ;;  %v436_v28 = vld [vmem:[#allocation3] ss:$8 sm:$0x3] }
 0x103   : > { %v528_v39 = vmul.f32 %v515_v31, %v508_v36  ;;  %v529_v40 = vmul.f32 %v519_v32, %v504_v35  ;;  %v526_v41 = vmul.f32 %v515_v31, %v507_v38  ;;  %v527_v42 = vmul.f32 %v519_v32, %v503_v37 }
 0x104   : > { %v441_v33 = vrot.slane %v436_v28, %v3785_v13  ;;  %v445_v34 = vrot.slane %v436_v28, %v3779_v12 }
 0x105   : > { %v1181_v44 = vpop.permute.xlu1 %1180  ;;  %v1179_v45 = vpop.permute.xlu0 %1178  ;;  %v3137_v46 = vpack.c.bf16 %v529_v40, %v527_v42  ;;  %v3136_v47 = vpack.c.bf16 %v528_v39, %v526_v41 }
 0x107   : > { %1055 = vmatprep.subr.bf16.mxu1 %v3137_v46 }
 0x108   : > { %1056 = vmatpush1.bf16.msra.mxu1 %v3136_v47 }
 0x109   : > { %v1189_v50 = vpop.permute.xlu1 %1188  ;;  %v1187_v51 = vpop.permute.xlu0 %1186 }
 0x10a   : > { %v1194_v52 = vsel %vm1190_vm6, %v1181_v44, %v1189_v50  ;;  %v1198_v53 = vsel %vm1190_vm6, %v1189_v50, %v1181_v44  ;;  %v1193_v54 = vsel %vm1190_vm6, %v1179_v45, %v1187_v51  ;;  %v1197_v55 = vsel %vm1190_vm6, %v1187_v51, %v1179_v45  ;;  %v1126_v45 = vld [vmem:[#allocation3 + $0x6] ss:$8 sm:$0x3] }
 0x10b   : > { %v1218_v56 = vmul.f32 %v1205_v48, %v1194_v52  ;;  %v1219_v57 = vmul.f32 %v1209_v49, %v1198_v53  ;;  %v1216_v58 = vmul.f32 %v1205_v48, %v1193_v54  ;;  %v1217_v59 = vmul.f32 %v1209_v49, %v1197_v55 }
 0x10c   : > { %v1131_v50 = vrot.slane %v1126_v45, %v3785_v13  ;;  %v1135_v51 = vrot.slane %v1126_v45, %v3779_v12 }
 0x10d   : > { %v3148_v60 = vpack.c.bf16 %v1218_v56, %v1216_v58  ;;  %v487_v61 = vpop.permute.xlu1 %486  ;;  %v485_v62 = vpop.permute.xlu0 %484  ;;  %v3149_v63 = vpack.c.bf16 %v1219_v57, %v1217_v59 }
 0x10f   : > { %1423 = vmatprep.subr.bf16.mxu0 %v3149_v63 }
 0x110   : > { %1424 = vmatpush1.bf16.msra.mxu0 %v3148_v60 }
 0x111   : > { %v495_v0 = vpop.permute.xlu1 %494  ;;  %v493_v1 = vpop.permute.xlu0 %492 }
 0x112   : > { %v502_v2 = vsel %vm500_vm5, %v487_v61, %v495_v0  ;;  %v506_v3 = vsel %vm500_vm5, %v495_v0, %v487_v61  ;;  %v501_v6 = vsel %vm500_vm5, %v485_v62, %v493_v1  ;;  %v505_v7 = vsel %vm500_vm5, %v493_v1, %v485_v62 }
 0x113   : > { %v524_v9 = vmul.f32 %v515_v31, %v506_v3  ;;  %v525_v10 = vmul.f32 %v519_v32, %v502_v2  ;;  %v522_v14 = vmul.f32 %v515_v31, %v505_v7  ;;  %v523_v15 = vmul.f32 %v519_v32, %v501_v6 }
 0x115   : > { %v1177_v16 = vpop.permute.xlu1 %1176  ;;  %v1175_v17 = vpop.permute.xlu0 %1174  ;;  %v3135_v4 = vpack.c.bf16 %v525_v10, %v523_v15  ;;  %v3134_v5 = vpack.c.bf16 %v524_v9, %v522_v14 }
 0x117   : > { %1057 = vmatprep.subr.bf16.mxu1 %v3135_v4 }
 0x118   : > { %1058 = vmatpush1.bf16.msra.mxu1 %v3134_v5 }
 0x119   : > { %v1185_v18 = vpop.permute.xlu1 %1184  ;;  %v1183_v19 = vpop.permute.xlu0 %1182 }
 0x11a   : > { %v1192_v20 = vsel %vm1190_vm6, %v1177_v16, %v1185_v18  ;;  %v1196_v21 = vsel %vm1190_vm6, %v1185_v18, %v1177_v16  ;;  %v1191_v22 = vsel %vm1190_vm6, %v1175_v17, %v1183_v19  ;;  %v1195_v23 = vsel %vm1190_vm6, %v1183_v19, %v1175_v17 }
 0x11b   : > { %v1214_v24 = vmul.f32 %v1205_v48, %v1192_v20  ;;  %v1215_v25 = vmul.f32 %v1209_v49, %v1196_v21  ;;  %v1212_v26 = vmul.f32 %v1205_v48, %v1191_v22  ;;  %v1213_v27 = vmul.f32 %v1209_v49, %v1195_v23  ;;  %v3278_v20 = vld [vmem:[%s4742_s2] sm:$0xff]  }
 0x11d   : > { %v3146_v29 = vpack.c.bf16 %v1214_v24, %v1212_v26  ;;  %v416_v30 = vpop.permute.xlu1 %415  ;;  %v414_v31 = vpop.permute.xlu0 %413  ;;  %v3147_v32 = vpack.c.bf16 %v1215_v25, %v1213_v27 }
 0x11f   : > { %1425 = vmatprep.subr.bf16.mxu0 %v3147_v32 }
 0x120   : > { %1426 = vmatpush1.bf16.msra.mxu0 %v3146_v29 }
 0x121   : > { %v424_v35 = vpop.permute.xlu1 %423  ;;  %v422_v36 = vpop.permute.xlu0 %421 }
 0x122   : > { %v431_v37 = vsel %vm427_vm7, %v416_v30, %v424_v35  ;;  %v435_v38 = vsel %vm427_vm7, %v424_v35, %v416_v30  ;;  %v430_v39 = vsel %vm427_vm7, %v414_v31, %v422_v36  ;;  %v434_v40 = vsel %vm427_vm7, %v422_v36, %v414_v31  ;;  %v3281_v35 = vld [vmem:[%s4742_s2 + $0x28] sm:$0xff]  }
 0x123   : > { %v454_v41 = vmul.f32 %v441_v33, %v435_v38  ;;  %v455_v42 = vmul.f32 %v445_v34, %v431_v37  ;;  %v452_v43 = vmul.f32 %v441_v33, %v434_v40  ;;  %v453_v44 = vmul.f32 %v445_v34, %v430_v39 }
 0x125   : > { %v1107_v46 = vpop.permute.xlu1 %1106  ;;  %v1105_v47 = vpop.permute.xlu0 %1104  ;;  %v3133_v48 = vpack.c.bf16 %v455_v42, %v453_v44  ;;  %v3132_v49 = vpack.c.bf16 %v454_v41, %v452_v43 }
 0x127   : > { %1059 = vmatprep.subr.bf16.mxu1 %v3133_v48 }
 0x128   : > { %1060 = vmatpush1.bf16.msra.mxu1 %v3132_v49 }
 0x129   : > { %v1115_v52 = vpop.permute.xlu1 %1114  ;;  %v1113_v53 = vpop.permute.xlu0 %1112 }
 0x12a   : > { %v1120_v54 = vsel %vm1116_vm8, %v1107_v46, %v1115_v52  ;;  %v1124_v55 = vsel %vm1116_vm8, %v1115_v52, %v1107_v46  ;;  %v1119_v56 = vsel %vm1116_vm8, %v1105_v47, %v1113_v53  ;;  %v1123_v57 = vsel %vm1116_vm8, %v1113_v53, %v1105_v47 }
 0x12b   : > { %v1144_v58 = vmul.f32 %v1131_v50, %v1120_v54  ;;  %v1145_v59 = vmul.f32 %v1135_v51, %v1124_v55  ;;  %v1142_v60 = vmul.f32 %v1131_v50, %v1119_v56  ;;  %v1143_v61 = vmul.f32 %v1135_v51, %v1123_v57 }
 0x12d   : > { %v3144_v62 = vpack.c.bf16 %v1144_v58, %v1142_v60  ;;  %v412_v63 = vpop.permute.xlu1 %411  ;;  %v410_v0 = vpop.permute.xlu0 %409  ;;  %v3145_v1 = vpack.c.bf16 %v1145_v59, %v1143_v61 }
 0x12f   : > { %1427 = vmatprep.subr.bf16.mxu0 %v3145_v1 }
 0x130   : > { %1428 = vmatpush1.bf16.msra.mxu0 %v3144_v62 }
 0x131   : > { %v420_v2 = vpop.permute.xlu1 %419  ;;  %v418_v3 = vpop.permute.xlu0 %417 }
 0x132   : > { %v429_v6 = vsel %vm427_vm7, %v412_v63, %v420_v2  ;;  %v433_v7 = vsel %vm427_vm7, %v420_v2, %v412_v63  ;;  %v428_v9 = vsel %vm427_vm7, %v410_v0, %v418_v3  ;;  %v432_v10 = vsel %vm427_vm7, %v418_v3, %v410_v0 }
 0x133   : > { %v450_v14 = vmul.f32 %v441_v33, %v433_v7  ;;  %v451_v15 = vmul.f32 %v445_v34, %v429_v6  ;;  %v448_v16 = vmul.f32 %v441_v33, %v432_v10  ;;  %v449_v17 = vmul.f32 %v445_v34, %v428_v9  ;;  %v3279_v33 = vld [vmem:[%s4742_s2 + $0x8] sm:$0xff]   ;;  %v3280_v34 = vld [vmem:[%s4742_s2 + $0x20] sm:$0xff]  }
 0x135   : > { %v1103_v4 = vpop.permute.xlu1 %1102  ;;  %v1101_v5 = vpop.permute.xlu0 %1100  ;;  %v3131_v18 = vpack.c.bf16 %v451_v15, %v449_v17  ;;  %v3130_v19 = vpack.c.bf16 %v450_v14, %v448_v16 }
 0x137   : > { %1061 = vmatprep.subr.bf16.mxu1 %v3131_v18 }
 0x138   : > { %1062 = vmatpush1.bf16.msra.mxu1 %v3130_v19 }
 0x139   : > { %v1111_v21 = vpop.permute.xlu1 %1110 }
 0x13a   : > { %v1118_v22 = vsel %vm1116_vm8, %v1103_v4, %v1111_v21  ;;  %v1122_v23 = vsel %vm1116_vm8, %v1111_v21, %v1103_v4  ;;  %v1109_v24 = vpop.permute.xlu0 %1108 }
 0x13b   : > { %v1140_v25 = vmul.f32 %v1131_v50, %v1118_v22  ;;  %v1141_v26 = vmul.f32 %v1135_v51, %v1122_v23  ;;  %v1117_v27 = vsel %vm1116_vm8, %v1101_v5, %v1109_v24  ;;  %v1121_v28 = vsel %vm1116_vm8, %v1109_v24, %v1101_v5  ;;  %2917 = vmatmul.mubr.msk.bf16.vlgmr.msra.gmra.mxu1 %vm911_vm3, %v3278_v20 }
 0x13c   : > { %v1138_v29 = vmul.f32 %v1131_v50, %v1117_v27  ;;  %v1139_v30 = vmul.f32 %v1135_v51, %v1121_v28  ;;  %1089 = vmatprep.mubr.bf16.mxu1 %v4757_v8 }
 0x13e   : > { %v3142_v31 = vpack.c.bf16 %v1140_v25, %v1138_v29  ;;  %v3143_v32 = vpack.c.bf16 %v1141_v26, %v1139_v30 }
 0x140   : > { %1429 = vmatprep.subr.bf16.mxu0 %v3143_v32 }
 0x141   : > { %1430 = vmatpush1.bf16.msra.mxu0 %v3142_v31 }
 0x143   : > { %2918 = vmatmul.mubr.msk.bf16.gmra.mxu1 %vm911_vm3, %v3279_v33 }
 0x144   : > { %2949 = vmatmul.mubr.msk.bf16.vlgmr.msra.gmra.mxu0 %vm911_vm3, %v3280_v34  ;;  %2045 = vmatprep.mubr.bf16.mxu1 %v4757_v8 }
 0x145   : > { %1457 = vmatprep.mubr.bf16.mxu0 %v4757_v8 }
 0x146   : > { %v4003_v43 = vpop.permute.xlu1 %1497 }
 0x147   : > { %v4007_v48 = vpop.permute.xlu0 %1492 }
 0x14a   : > { %v1483_v49 = vpop.permute.xlu1 %1482 }
 0x14b   : > { %v1488_v59 = vpop.permute.xlu0 %1487 }
 0x14c   : > { %2950 = vmatmul.mubr.msk.bf16.gmra.mxu0 %vm911_vm3, %v3281_v35 }
 0x14d   : > { %2174 = vmatprep.mubr.bf16.mxu0 %v4757_v8 }
 0x1a3   : > { %v952_v36 = vpop.f32.mrf.mxu0 }
 0x1a5   : > { %v954_v37 = vpop.f32.mrf.mxu0 }
 0x1a7   : > { %v956_v38 = vpop.f32.mrf.mxu0 }
 0x1a9   : > { %v958_v39 = vpop.f32.mrf.mxu0 }
 0x1ab   : > { %v962_v40 = vpop.f32.mrf.mxu0 }
 0x1ad   : > { %v4001_v41 = vpop.f32.mrf.mxu0 }
 0x1af   : > { %v966_v44 = vpop.f32.mrf.mxu0 }
 0x1b1   : > { %v4005_v46 = vpop.f32.mrf.mxu0 }
 0x1fb   : > { %v1081_v42 = vpop.f32.mrf.mxu1 }
 0x1fc   : > { %v1082_v47 = vadd.f32 %v1081_v42, %v952_v36 }
 0x1fd   : > { %v1083_v45 = vpop.f32.mrf.mxu1 }
 0x1fe   : > { %v1084_v62 = vadd.f32 %v1083_v45, %v954_v37  ;;  %v2566_v45 = vld [vmem:[%s4745_s5 + $0x8] sm:$0xff] }
 0x1ff   : > { %v1085_v50 = vpop.f32.mrf.mxu1 }
 0x200   : > { %v1086_v54 = vadd.f32 %v1085_v50, %v956_v38 }
 0x201   : > { %v1087_v63 = vpop.f32.mrf.mxu1 }
 0x202   : > { %v1088_v2 = vadd.f32 %v1087_v63, %v958_v39 }
 0x203   : > { %v1091_v14 = vpop.f32.mrf.mxu1 }
 0x204   : > { %v1449_v51 = vpop.f32.mrf.mxu0  ;;  %v1092_v4 = vadd.f32 %v1091_v14, %v962_v40 }
 0x205   : > { %v1468_v52 = vadd.f32 %v1449_v51, %v1082_v47  ;;  %v1093_v16 = vpop.f32.mrf.mxu1  ;;  %v1872_v51 = vld [vmem:[#allocation3 + $0x5] ss:$8 sm:$0x3] }
 0x206   : > { %v1451_v53 = vpop.f32.mrf.mxu0  ;;  %v1094_v26 = vadd.f32 %v1093_v16, %v4001_v41  ;;  %v2565_v41 = vld [vmem:[%s4745_s5] sm:$0xff] }
 0x207   : > { %v1500_v55 = vadd.f32 %v1483_v49, %v1468_v52  ;;  %v1469_v0 = vadd.f32 %v1451_v53, %v1084_v62  ;;  %v1095_v5 = vpop.f32.mrf.mxu1 }
 0x208   : > { %v1453_v56 = vpop.f32.mrf.mxu0  ;;  %v1096_v20 = vadd.f32 %v1095_v5, %v966_v44  ;;  %v2567_v44 = vld [vmem:[%s4745_s5 + $0x10] sm:$0xff] }
 0x209   : > { %v4009_v57 = vmax.f32 %v1500_v55, 0.0  ;;  %v1470_v58 = vadd.f32 %v1453_v56, %v1086_v54  ;;  %v1501_v3 = vadd.f32 %v1483_v49, %v1469_v0  ;;  %v1097_v27 = vpop.f32.mrf.mxu1  ;;  %v1772_v54 = vld [vmem:[#allocation3 + $0x3] ss:$8 sm:$0x3]  ;;  %v4182_v55 = vrot.slane %v1872_v51, %v3785_v13 }
 0x20a   : > { %v1455_v1 = vpop.f32.mrf.mxu0  ;;  %v1098_v30 = vadd.f32 %v1097_v27, %v4005_v46  ;;  %v4185_v56 = vrot.slane %v1872_v51, %v3779_v12  ;;  %v4195_v62 = vrot.slane %v1772_v54, %v3779_v12  ;;  %v1612_v51 = vld [vmem:[#allocation3 + $0x1] ss:$8 sm:$0x3] }
 0x20b   : > { %v1502_v60 = vadd.f32 %v1488_v59, %v1470_v58  ;;  %1848 = vrot.lane.b32.xlu1 %v4009_v57, %s3467_s29  ;;  %v1471_v6 = vadd.f32 %v1455_v1, %v1088_v2  ;;  %v4035_v7 = vmax.f32 %v1501_v3, 0.0 }
 0x20c   : > { %v1459_v15 = vpop.f32.mrf.mxu0 }
 0x20d   : > { %v4013_v61 = vmax.f32 %v1502_v60, 0.0  ;;  %v1503_v9 = vadd.f32 %v1488_v59, %v1471_v6  ;;  %v1472_v18 = vadd.f32 %v1459_v15, %v1092_v4  ;;  %v4192_v60 = vrot.slane %v1772_v54, %v3785_v13 }
 0x20e   : > { %v1461_v17 = vpop.f32.mrf.mxu0 }
 0x20f   : > { %1748 = vrot.lane.b32.xlu1 %v4009_v57, %s3468_s11  ;;  %1850 = vrot.lane.b32.xlu0 %v4013_v61, %s3467_s29  ;;  %v4041_v10 = vmax.f32 %v1503_v9, 0.0  ;;  %v1504_v21 = vadd.f32 %v4007_v48, %v1472_v18  ;;  %v1473_v28 = vadd.f32 %v1461_v17, %v1094_v26  ;;  %v1684_v9 = vld [vmem:[#allocation3 + $0x2] ss:$8 sm:$0x3] }
 0x210   : > { %v1463_v19 = vpop.f32.mrf.mxu0  ;;  %v4220_v5 = vrot.slane %v1684_v9, %v3785_v13  ;;  %v4223_v18 = vrot.slane %v1684_v9, %v3779_v12 }
 0x211   : > { %v1474_v22 = vadd.f32 %v1463_v19, %v1096_v20  ;;  %v4064_v23 = vmax.f32 %v1504_v21, 0.0  ;;  %v1505_v31 = vadd.f32 %v4007_v48, %v1473_v28  ;;  %v2568_v48 = vld [vmem:[%s4745_s5 + $0x18] sm:$0xff] }
 0x212   : > { %v1465_v29 = vpop.f32.mrf.mxu0  ;;  %v2363_v28 = vld [vmem:[#allocation3 + $0x10] ss:$8 sm:$0x3] }
 0x213   : > { %1660 = vrot.lane.b32.xlu1 %v4009_v57, %s3469_s27  ;;  %1750 = vrot.lane.b32.xlu0 %v4013_v61, %s3468_s11  ;;  %v1506_v24 = vadd.f32 %v4003_v43, %v1474_v22  ;;  %v1475_v32 = vadd.f32 %v1465_v29, %v1098_v30  ;;  %v4104_v33 = vmax.f32 %v1505_v31, 0.0 }
 0x215   : > { %v4071_v25 = vmax.f32 %v1506_v24, 0.0  ;;  %v1507_v34 = vadd.f32 %v4003_v43, %v1475_v32 }
 0x217   : > { %2339 = vrot.lane.b32.xlu1 %v4009_v57, %s3471_s12  ;;  %1662 = vrot.lane.b32.xlu0 %v4013_v61, %s3469_s27  ;;  %v4111_v35 = vmax.f32 %v1507_v34, 0.0 }
 0x21b   : > { %1588 = vrot.lane.b32.xlu1 %v4009_v57, %s3472_s18  ;;  %2341 = vrot.lane.b32.xlu0 %v4013_v61, %s3471_s12 }
 0x21f   : > { %2267 = vrot.lane.b32.xlu1 %v4009_v57, %s3473_s20  ;;  %1590 = vrot.lane.b32.xlu0 %v4013_v61, %s3472_s18 }
 0x223   : > { %1856 = vrot.lane.b32.xlu1 %v4035_v7, %s3467_s29  ;;  %2269 = vrot.lane.b32.xlu0 %v4013_v61, %s3473_s20 }
 0x227   : > { %1756 = vrot.lane.b32.xlu1 %v4035_v7, %s3468_s11  ;;  %1858 = vrot.lane.b32.xlu0 %v4041_v10, %s3467_s29 }
 0x22b   : > { %1668 = vrot.lane.b32.xlu1 %v4035_v7, %s3469_s27  ;;  %1758 = vrot.lane.b32.xlu0 %v4041_v10, %s3468_s11 }
 0x22f   : > { %2347 = vrot.lane.b32.xlu1 %v4035_v7, %s3471_s12  ;;  %1670 = vrot.lane.b32.xlu0 %v4041_v10, %s3469_s27 }
 0x233   : > { %1596 = vrot.lane.b32.xlu1 %v4035_v7, %s3472_s18  ;;  %2349 = vrot.lane.b32.xlu0 %v4041_v10, %s3471_s12 }
 0x237   : > { %2275 = vrot.lane.b32.xlu1 %v4035_v7, %s3473_s20  ;;  %1598 = vrot.lane.b32.xlu0 %v4041_v10, %s3472_s18 }
 0x23b   : > { %2277 = vrot.lane.b32.xlu0 %v4041_v10, %s3473_s20  ;;  %1852 = vrot.lane.b32.xlu1 %v4064_v23, %s3467_s29 }
 0x23f   : > { %1752 = vrot.lane.b32.xlu1 %v4064_v23, %s3468_s11  ;;  %1854 = vrot.lane.b32.xlu0 %v4071_v25, %s3467_s29 }
 0x243   : > { %1664 = vrot.lane.b32.xlu1 %v4064_v23, %s3469_s27  ;;  %1754 = vrot.lane.b32.xlu0 %v4071_v25, %s3468_s11 }
 0x247   : > { %2343 = vrot.lane.b32.xlu1 %v4064_v23, %s3471_s12  ;;  %1666 = vrot.lane.b32.xlu0 %v4071_v25, %s3469_s27 }
 0x24b   : > { %1592 = vrot.lane.b32.xlu1 %v4064_v23, %s3472_s18  ;;  %2345 = vrot.lane.b32.xlu0 %v4071_v25, %s3471_s12 }
 0x24f   : > { %2271 = vrot.lane.b32.xlu1 %v4064_v23, %s3473_s20  ;;  %1594 = vrot.lane.b32.xlu0 %v4071_v25, %s3472_s18 }
 0x253   : > { %1520 = vrot.lane.b32.xlu1 %v4064_v23, %s4783_s21  ;;  %2273 = vrot.lane.b32.xlu0 %v4071_v25, %s3473_s20 }
 0x257   : > { %2199 = vrot.lane.b32.xlu1 %v4064_v23, %s4784_s15  ;;  %1522 = vrot.lane.b32.xlu0 %v4071_v25, %s4783_s21 }
 0x25b   : > { %1860 = vrot.lane.b32.xlu1 %v4104_v33, %s3467_s29  ;;  %2201 = vrot.lane.b32.xlu0 %v4071_v25, %s4784_s15 }
 0x25f   : > { %1516 = vrot.lane.b32.xlu1 %v4009_v57, %s4783_s21  ;;  %1862 = vrot.lane.b32.xlu0 %v4111_v35, %s3467_s29 }
 0x263   : > { %1760 = vrot.lane.b32.xlu1 %v4104_v33, %s3468_s11  ;;  %1518 = vrot.lane.b32.xlu0 %v4013_v61, %s4783_s21 }
 0x267   : > { %1672 = vrot.lane.b32.xlu1 %v4104_v33, %s3469_s27  ;;  %1526 = vrot.lane.b32.xlu0 %v4041_v10, %s4783_s21 }
 0x26b   : > { %2351 = vrot.lane.b32.xlu1 %v4104_v33, %s3471_s12  ;;  %2197 = vrot.lane.b32.xlu0 %v4013_v61, %s4784_s15 }
 0x26f   : > { %1600 = vrot.lane.b32.xlu1 %v4104_v33, %s3472_s18  ;;  %1762 = vrot.lane.b32.xlu0 %v4111_v35, %s3468_s11  ;;  %s3117_s11 = sshll.u32 %s3554_s17, 10 }
 0x270   : > { %s4689_s30 = scalar_lea.hbm %s4750_s10, %s3117_s11 }
 0x273   : > { %2279 = vrot.lane.b32.xlu1 %v4104_v33, %s3473_s20  ;;  %1674 = vrot.lane.b32.xlu0 %v4111_v35, %s3469_s27 }
 0x277   : > { %1528 = vrot.lane.b32.xlu1 %v4104_v33, %s4783_s21  ;;  %2353 = vrot.lane.b32.xlu0 %v4111_v35, %s3471_s12 }
 0x27b   : > { %2207 = vrot.lane.b32.xlu1 %v4104_v33, %s4784_s15  ;;  %1602 = vrot.lane.b32.xlu0 %v4111_v35, %s3472_s18 }
 0x27d   : > { %v1849_v36 = vpop.permute.xlu1 %1848 }
 0x27f   : > { %1524 = vrot.lane.b32.xlu1 %v4035_v7, %s4783_s21  ;;  %2281 = vrot.lane.b32.xlu0 %v4111_v35, %s3473_s20 }
 0x281   : > { %v1749_v37 = vpop.permute.xlu1 %1748  ;;  %v1851_v38 = vpop.permute.xlu0 %1850 }
 0x283   : > { %2195 = vrot.lane.b32.xlu1 %v4009_v57, %s4784_s15  ;;  %1530 = vrot.lane.b32.xlu0 %v4111_v35, %s4783_s21 }
 0x285   : > { %v1661_v39 = vpop.permute.xlu1 %1660  ;;  %v1751_v40 = vpop.permute.xlu0 %1750 }
 0x287   : > { %2203 = vrot.lane.b32.xlu1 %v4035_v7, %s4784_s15  ;;  %2209 = vrot.lane.b32.xlu0 %v4111_v35, %s4784_s15 }
 0x289   : > { %v2340_v42 = vpop.permute.xlu1 %2339  ;;  %v1663_v43 = vpop.permute.xlu0 %1662 }
 0x28b   : > { %2571 = vperm.xlu1 %3275, %v2565_v41   ;;  %2205 = vrot.lane.b32.xlu0 %v4041_v10, %s4784_s15  ;;  %s392_s15 = sand.u32 1, %s3450_s14  }
 0x28c   : > { %s2856_s29 = sshll.u32 %s392_s15, 6  ;;  %s4699_s25 = scalar_lea.sflag [#allocation5], %s392_s15 }
 0x28d   : > { %v4168_v46 = vpop.permute.xlu1 %1588  ;;  %v4170_v47 = vpop.permute.xlu0 %2341  ;;  %s394_s27 = scalar_lea.vmem [#allocation9], %s2856_s29 }
 0x28e   : > { %s2753_s12 = sshll.u32 %s394_s27, 4  ;;  %s4695_s12 = int_to_ptr.vmem [resolvable:$true] %s2753_s12 }
 0x28f   : > { %2581 = vperm.xlu1 %3275, %v2567_v44   ;;  %2576 = vperm.xlu0 %3274, %v2566_v45   ;;  %s3390_s22 = scalar_lea.vmem %s4695_s12, 1024 }
 0x290   : > { %p3391_p10 = scmp.ne.s32.totalorder %s4695_s12, %s3390_s22 }
 0x291   : > { %v4175_v49 = vpop.permute.xlu1 %2267  ;;  %v4177_v50 = vpop.permute.xlu0 %1590 }
 0x292   : > { %p3392_p12 = pnand %p3391_p10, %p3571_p5 }
 0x293   : > { %2586 = vperm.xlu0 %3274, %v2568_v48  }
 0x294   : > { %p3393_p7 = pneg %p3392_p12 }
 0x295   : > { %v1857_v52 = vpop.permute.xlu1 %1856  ;;  %v4179_v53 = vpop.permute.xlu0 %2269 }
 0x296   : > { %v1864_v58 = vsel %vm766_vm0, %v1849_v36, %v1857_v52  ;;  %v1868_v59 = vsel %vm766_vm0, %v1857_v52, %v1849_v36  ;;  %v4250_v36 = vrot.slane %v2363_v28, %v3785_v13 }
 0x297   : > { %v4206_v14 = vmul.f32 %v4182_v55, %v1864_v58  ;;  %v4209_v15 = vmul.f32 %v4185_v56, %v1868_v59 }
 0x299   : > { %v1757_v63 = vpop.permute.xlu1 %1756  ;;  %v1859_v0 = vpop.permute.xlu0 %1858 }
 0x29a   : > { %v1764_v1 = vsel %vm664_vm1, %v1749_v37, %v1757_v63  ;;  %v1768_v2 = vsel %vm664_vm1, %v1757_v63, %v1749_v37  ;;  %v1865_v3 = vsel %vm766_vm0, %v1851_v38, %v1859_v0  ;;  %v1869_v6 = vsel %vm766_vm0, %v1859_v0, %v1851_v38 }
 0x29b   : > { %v4212_v16 = vmul.f32 %v4182_v55, %v1865_v3  ;;  %v4215_v17 = vmul.f32 %v4185_v56, %v1869_v6  ;;  %v4236_v29 = vmul.f32 %v4192_v60, %v1768_v2  ;;  %v4239_v30 = vmul.f32 %v4195_v62, %v1764_v1 }
 0x29c   : > { %v4253_v37 = vrot.slane %v2363_v28, %v3779_v12  ;;  %v4280_v63 = vrot.slane %v1612_v51, %v3785_v13 }
 0x29d   : > { %v1669_v19 = vpop.permute.xlu1 %1668  ;;  %v1759_v20 = vpop.permute.xlu0 %1758 }
 0x29e   : > { %v1676_v22 = vsel %vm574_vm2, %v1661_v39, %v1669_v19  ;;  %v1680_v24 = vsel %vm574_vm2, %v1669_v19, %v1661_v39  ;;  %v1765_v26 = vsel %vm664_vm1, %v1751_v40, %v1759_v20  ;;  %v1769_v27 = vsel %vm664_vm1, %v1759_v20, %v1751_v40  ;;  %v2291_v20 = vld [vmem:[#allocation3 + $0x7] ss:$8 sm:$0x3] }
 0x29f   : > { %v4242_v31 = vmul.f32 %v4192_v60, %v1769_v27  ;;  %v4245_v32 = vmul.f32 %v4195_v62, %v1765_v26  ;;  %v4266_v52 = vmul.f32 %v4220_v5, %v1680_v24  ;;  %v4269_v54 = vmul.f32 %v4223_v18, %v1676_v22 }
 0x2a0   : > { %v4314_v28 = vrot.slane %v2291_v20, %v3785_v13 }
 0x2a1   : > { %v2348_v38 = vpop.permute.xlu1 %2347  ;;  %v1671_v39 = vpop.permute.xlu0 %1670 }
 0x2a2   : > { %v2355_v41 = vsel %vm1264_vm4, %v2340_v42, %v2348_v38  ;;  %v2359_v44 = vsel %vm1264_vm4, %v2348_v38, %v2340_v42  ;;  %v1677_v45 = vsel %vm574_vm2, %v1663_v43, %v1671_v39  ;;  %v1681_v48 = vsel %vm574_vm2, %v1671_v39, %v1663_v43 }
 0x2a3   : > { %v4272_v58 = vmul.f32 %v4220_v5, %v1681_v48  ;;  %v4275_v59 = vmul.f32 %v4223_v18, %v1677_v45  ;;  %v4283_v43 = vrot.slane %v1612_v51, %v3779_v12  ;;  %v4300_v22 = vmul.f32 %v4250_v36, %v2355_v41 }
 0x2a4   : > { %v4303_v24 = vmul.f32 %v4253_v37, %v2359_v44 }
 0x2a5   : > { %v1597_v0 = vpop.permute.xlu1 %1596  ;;  %v2350_v1 = vpop.permute.xlu0 %2349  ;;  %4785 = vst [vmem:[#allocation15_spill] sm:$0xff] %v4300_v22 }
 0x2a6   : > { %v1604_v3 = vsel %vm500_vm5, %v4168_v46, %v1597_v0  ;;  %v1608_v6 = vsel %vm500_vm5, %v1597_v0, %v4168_v46  ;;  %v2356_v9 = vsel %vm1264_vm4, %v4170_v47, %v2350_v1  ;;  %v2360_v19 = vsel %vm1264_vm4, %v2350_v1, %v4170_v47 }
 0x2a7   : > { %v4306_v26 = vmul.f32 %v4250_v36, %v2356_v9  ;;  %v4309_v46 = vmul.f32 %v4253_v37, %v2360_v19  ;;  %v4317_v47 = vrot.slane %v2291_v20, %v3779_v12  ;;  %v4334_v0 = vmul.f32 %v4280_v63, %v1608_v6 }
 0x2a8   : > { %v4337_v1 = vmul.f32 %v4283_v43, %v1604_v3 }
 0x2a9   : > { %4786 = vst [vmem:[#allocation16_spill] sm:$0xff] %v4306_v26  ;;  %v2276_v38 = vpop.permute.xlu1 %2275  ;;  %v1599_v39 = vpop.permute.xlu0 %1598  ;;  %4787 = vst [vmem:[#allocation17_spill] sm:$0xff] %v4334_v0 }
 0x2aa   : > { %v2283_v44 = vsel %vm1190_vm6, %v4175_v49, %v2276_v38  ;;  %v2287_v45 = vsel %vm1190_vm6, %v2276_v38, %v4175_v49  ;;  %v1605_v48 = vsel %vm500_vm5, %v4177_v50, %v1599_v39  ;;  %v1609_v51 = vsel %vm500_vm5, %v1599_v39, %v4177_v50  ;;  %4788 = vst [vmem:[#allocation18_spill] sm:$0xff] %v4337_v1 }
 0x2ab   : > { %v4340_v9 = vmul.f32 %v4280_v63, %v1609_v51  ;;  %v4343_v19 = vmul.f32 %v4283_v43, %v1605_v48  ;;  %v4356_v39 = vmul.f32 %v4314_v28, %v2283_v44  ;;  %v4359_v48 = vmul.f32 %v4317_v47, %v2287_v45 }
 0x2ad   : > { %4789 = vst [vmem:[#allocation19_spill] sm:$0xff] %v4340_v9  ;;  %4790 = vst [vmem:[#allocation20_spill] sm:$0xff] %v4343_v19  ;;  %v2278_v20 = vpop.permute.xlu0 %2277  ;;  %v1853_v38 = vpop.permute.xlu1 %1852 }
 0x2ae   : > { %v2284_v6 = vsel %vm1190_vm6, %v4179_v53, %v2278_v20  ;;  %v2288_v3 = vsel %vm1190_vm6, %v2278_v20, %v4179_v53  ;;  %4791 = vst [vmem:[#allocation21_spill] sm:$0xff] %v4356_v39  ;;  %4792 = vst [vmem:[#allocation22_spill] sm:$0xff] %v4359_v48 }
 0x2af   : > { %v4362_v51 = vmul.f32 %v4314_v28, %v2284_v6  ;;  %v4365_v49 = vmul.f32 %v4317_v47, %v2288_v3 }
 0x2b1   : > { %4793 = vst [vmem:[#allocation23_spill] sm:$0xff] %v4362_v51  ;;  %4794 = vst [vmem:[#allocation24_spill] sm:$0xff] %v4365_v49  ;;  %v1753_v27 = vpop.permute.xlu1 %1752  ;;  %v1855_v41 = vpop.permute.xlu0 %1854 }
 0x2b5   : > { %v1665_v20 = vpop.permute.xlu1 %1664  ;;  %v1755_v44 = vpop.permute.xlu0 %1754 }
 0x2b9   : > { %v4371_v8 = vpop.permute.xlu1 %2343  ;;  %v1667_v45 = vpop.permute.xlu0 %1666 }
 0x2bd   : > { %v4373_v42 = vpop.permute.xlu1 %1592  ;;  %v4375_v6 = vpop.permute.xlu0 %2345 }
 0x2c1   : > { %v4377_v2 = vpop.permute.xlu1 %2271  ;;  %v4379_v3 = vpop.permute.xlu0 %1594 }
 0x2c5   : > { %v4381_v34 = vpop.permute.xlu1 %1520  ;;  %v4383_v50 = vpop.permute.xlu0 %2273 }
 0x2c9   : > { %v4385_v40 = vpop.permute.xlu1 %2199  ;;  %v4387_v53 = vpop.permute.xlu0 %1522 }
 0x2ca   : > { %4795 = vst [vmem:[#allocation25_spill] sm:$0xff] %v4385_v40  ;;  %4796 = vst [vmem:[#allocation26_spill] sm:$0xff] %v4387_v53 }
 0x2cd   : > { %v1861_v4 = vpop.permute.xlu1 %1860  ;;  %v4389_v21 = vpop.permute.xlu0 %2201 }
 0x2ce   : > { %4797 = vst [vmem:[#allocation27_spill] sm:$0xff] %v4389_v21  ;;  %v1866_v39 = vsel %vm766_vm0, %v1853_v38, %v1861_v4  ;;  %v1870_v51 = vsel %vm766_vm0, %v1861_v4, %v1853_v38 }
 0x2cf   : > { %v1888_v53 = vmul.f32 %v4182_v55, %v1866_v39  ;;  %v1889_v40 = vmul.f32 %v4185_v56, %v1870_v51 }
 0x2d1   : > { %v4395_v48 = vpop.permute.xlu1 %1516  ;;  %v1863_v49 = vpop.permute.xlu0 %1862 }
 0x2d2   : > { %4798 = vst [vmem:[#allocation28_spill] sm:$0xff] %v4395_v48  ;;  %v1867_v0 = vsel %vm766_vm0, %v1855_v41, %v1863_v49  ;;  %v1871_v9 = vsel %vm766_vm0, %v1863_v49, %v1855_v41  ;;  %v4799_v48 = vpack.c.bf16 %v4215_v17, %v4209_v15  ;;  %v3161_v49 = vpack.c.bf16 %v4111_v35, %v4104_v33 }
 0x2d3   : > { %v1890_v21 = vmul.f32 %v4182_v55, %v1867_v0  ;;  %v1891_v1 = vmul.f32 %v4185_v56, %v1871_v9  ;;  %v4800_v55 = vpack.c.bf16 %v4212_v16, %v4206_v14  ;;  %v3159_v15 = vpack.c.bf16 %v4041_v10, %v4035_v7 }
 0x2d5   : > { %v3164_v19 = vpack.c.bf16 %v1890_v21, %v1888_v53  ;;  %v1761_v22 = vpop.permute.xlu1 %1760  ;;  %v4405_v4 = vpop.permute.xlu0 %1518  ;;  %v3165_v38 = vpack.c.bf16 %v1891_v1, %v1889_v40  ;;  %v3160_v40 = vpack.c.bf16 %v4071_v25, %v4064_v23  ;;  %v3158_v23 = vpack.c.bf16 %v4013_v61, %v4009_v57 }
 0x2d6   : > { %v1766_v17 = vsel %vm664_vm1, %v1753_v27, %v1761_v22  ;;  %v1770_v33 = vsel %vm664_vm1, %v1761_v22, %v1753_v27 }
 0x2d7   : > { %2017 = vmatprep.subr.bf16.mxu1 %v3165_v38  ;;  %v1788_v7 = vmul.f32 %v4192_v60, %v1770_v33  ;;  %v1789_v10 = vmul.f32 %v4195_v62, %v1766_v17 }
 0x2d8   : > { %2018 = vmatpush1.bf16.msra.mxu1 %v3164_v19 }
 0x2d9   : > { %v1673_v26 = vpop.permute.xlu1 %1672  ;;  %2019 = vmatprep.subr.bf16.mxu1 %v4799_v48  ;;  %v4410_v41 = vpop.permute.xlu0 %1526 }
 0x2da   : > { %v1678_v27 = vsel %vm574_vm2, %v1665_v20, %v1673_v26  ;;  %v1682_v1 = vsel %vm574_vm2, %v1673_v26, %v1665_v20 }
 0x2dc   : > { %2020 = vmatpush1.bf16.msra.mxu1 %v4800_v55 }
 0x2dd   : > { %v2352_v56 = vpop.permute.xlu1 %2351  ;;  %v4417_v21 = vpop.permute.xlu0 %2197  ;;  %2021 = vmatprep.subr.bf16.mxu1 %v3161_v49  ;;  %v4801_v49 = vpack.c.bf16 %v4245_v32, %v4239_v30  ;;  %v3282_v30 = vld [vmem:[#allocation6 + $0x10] sm:$0xff]  }
 0x2de   : > { %v2357_v26 = vsel %vm1264_vm4, %v4371_v8, %v2352_v56  ;;  %v2361_v20 = vsel %vm1264_vm4, %v2352_v56, %v4371_v8 }
 0x2df   : > { %v2379_v8 = vmul.f32 %v4250_v36, %v2357_v26  ;;  %v2380_v56 = vmul.f32 %v4253_v37, %v2361_v20  ;;  %v4808_v20 = vld [vmem:[#allocation16_spill] sm:$0xff] }
 0x2e0   : > { %2022 = vmatpush1.bf16.msra.mxu1 %v3160_v40  ;;  %v1540_v40 = vld [vmem:[#allocation3] ss:$8 sm:$0x3] }
 0x2e1   : > { %v1601_v35 = vpop.permute.xlu1 %1600  ;;  %v1763_v14 = vpop.permute.xlu0 %1762  ;;  %2023 = vmatprep.subr.bf16.mxu1 %v3159_v15 }
 0x2e2   : > { %v1767_v16 = vsel %vm664_vm1, %v1755_v44, %v1763_v14  ;;  %v1771_v0 = vsel %vm664_vm1, %v1763_v14, %v1755_v44  ;;  %v1606_v32 = vsel %vm500_vm5, %v4373_v42, %v1601_v35  ;;  %v1610_v33 = vsel %vm500_vm5, %v1601_v35, %v4373_v42 }
 0x2e3   : > { %v1790_v25 = vmul.f32 %v4192_v60, %v1771_v0  ;;  %v1791_v22 = vmul.f32 %v4195_v62, %v1767_v16  ;;  %v1700_v60 = vmul.f32 %v4220_v5, %v1682_v1  ;;  %v1701_v62 = vmul.f32 %v4223_v18, %v1678_v27 }
 0x2e4   : > { %2024 = vmatpush1.bf16.msra.mxu1 %v3158_v23  ;;  %v4481_v23 = vrot.slane %v1540_v40, %v3785_v13  ;;  %v1629_v35 = vmul.f32 %v4283_v43, %v1606_v32 }
 0x2e5   : > { %v3156_v9 = vpack.c.bf16 %v1790_v25, %v1788_v7  ;;  %v2280_v19 = vpop.permute.xlu1 %2279  ;;  %v1675_v39 = vpop.permute.xlu0 %1674  ;;  %v3157_v48 = vpack.c.bf16 %v1791_v22, %v1789_v10  ;;  %v2219_v7 = vld [vmem:[#allocation3 + $0x6] ss:$8 sm:$0x3]  ;;  %v1549_v10 = vrot.slane %v1540_v40, %v3779_v12  ;;  %v4804_v22 = vpack.c.bf16 %v4272_v58, %v4266_v52 }
 0x2e6   : > { %v1679_v57 = vsel %vm574_vm2, %v1667_v45, %v1675_v39  ;;  %v1683_v61 = vsel %vm574_vm2, %v1675_v39, %v1667_v45  ;;  %v2285_v25 = vsel %vm1190_vm6, %v4377_v2, %v2280_v19  ;;  %v4805_v39 = vmov 0   ;;  %v4814_v40 = vld [vmem:[#allocation25_spill] sm:$0xff] }
 0x2e7   : > { %v1702_v51 = vmul.f32 %v4220_v5, %v1683_v61  ;;  %v1703_v53 = vmul.f32 %v4223_v18, %v1679_v57  ;;  %2025 = vmatprep.subr.bf16.mxu1 %v3157_v48  ;;  %v4806_v48 = vpack.c.bf16 %v4309_v46, %v4303_v24  ;;  %v2307_v57 = vmul.f32 %v4314_v28, %v2285_v25  ;;  %v4807_v46 = vld [vmem:[#allocation28_spill] sm:$0xff] }
 0x2e8   : > { %2026 = vmatpush1.bf16.msra.mxu1 %v3156_v9  ;;  %v2228_v24 = vrot.slane %v2219_v7, %v3779_v12 }
 0x2e9   : > { %v3176_v44 = vpack.c.bf16 %v1702_v51, %v1700_v60  ;;  %v1529_v45 = vpop.permute.xlu1 %1528  ;;  %v2354_v38 = vpop.permute.xlu0 %2353  ;;  %2027 = vmatprep.subr.bf16.mxu1 %v4801_v49  ;;  %v3177_v5 = vpack.c.bf16 %v1703_v53, %v1701_v62  ;;  %v3283_v62 = vld [vmem:[#allocation6 + $0x18] sm:$0xff]   ;;  %v1533_v51 = vsel %vm427_vm7, %v4405_v4, %v4410_v41  ;;  %v4812_v49 = vld [vmem:[#allocation18_spill] sm:$0xff] }
 0x2ea   : > { %v2358_v18 = vsel %vm1264_vm4, %v4375_v6, %v2354_v38  ;;  %v2362_v55 = vsel %vm1264_vm4, %v2354_v38, %v4375_v6  ;;  %v4802_v6 = vpack.c.bf16 %v4242_v31, %v4236_v29  ;;  %v1628_v31 = vmul.f32 %v4280_v63, %v1610_v33  ;;  %v4811_v38 = vld [vmem:[#allocation20_spill] sm:$0xff] }
 0x2eb   : > { %v2381_v15 = vmul.f32 %v4250_v36, %v2358_v18  ;;  %v2382_v17 = vmul.f32 %v4253_v37, %v2362_v55  ;;  %2146 = vmatprep.subr.bf16.mxu0 %v3177_v5  ;;  %v4803_v36 = vpack.c.bf16 %v4275_v59, %v4269_v54  ;;  %v4813_v5 = vpack.c.bf16 %v4811_v38, %v4812_v49 }
 0x2ec   : > { %2028 = vmatpush1.bf16.msra.mxu1 %v4802_v6  ;;  %2147 = vmatpush1.bf16.msra.mxu0 %v3176_v44 }
 0x2ed   : > { %v3188_v14 = vpack.c.bf16 %v2381_v15, %v2379_v8  ;;  %v2208_v16 = vpop.permute.xlu1 %2207  ;;  %2148 = vmatprep.subr.bf16.mxu0 %v4803_v36  ;;  %v1603_v37 = vpop.permute.xlu0 %1602  ;;  %v3189_v0 = vpack.c.bf16 %v2382_v17, %v2380_v56  ;;  %v4815_v56 = vld [vmem:[#allocation26_spill] sm:$0xff]  ;;  %v4817_v36 = vld [vmem:[#allocation17_spill] sm:$0xff] }
 0x2ee   : > { %v1607_v42 = vsel %vm500_vm5, %v4379_v3, %v1603_v37  ;;  %v1611_v29 = vsel %vm500_vm5, %v1603_v37, %v4379_v3  ;;  %v2289_v3 = vsel %vm1190_vm6, %v2280_v19, %v4377_v2  ;;  %v1534_v2 = vsel %vm427_vm7, %v4381_v34, %v1529_v45 }
 0x2ef   : > { %v1630_v54 = vmul.f32 %v4280_v63, %v1611_v29  ;;  %v1631_v59 = vmul.f32 %v4283_v43, %v1607_v42  ;;  %2989 = vmatmul.mubr.msk.bf16.vlgmr.msra.gmra.mxu1 %vm911_vm3, %v3282_v30  ;;  %2508 = vmatprep.subr.bf16.mxu1 %v3189_v0  ;;  %v1538_v63 = vsel %vm427_vm7, %v1529_v45, %v4381_v34 }
 0x2f0   : > { %2149 = vmatpush1.bf16.msra.mxu0 %v4804_v22  ;;  %2509 = vmatpush1.bf16.msra.mxu1 %v3188_v14  ;;  %v4512_v19 = vrot.slane %v2219_v7, %v3785_v13  ;;  %v2308_v61 = vmul.f32 %v4317_v47, %v2289_v3  ;;  %v1557_v26 = vmul.f32 %v1549_v10, %v1534_v2  ;;  %v4816_v14 = vld [vmem:[#allocation19_spill] sm:$0xff]  ;;  %v4820_v22 = vld [vmem:[#allocation24_spill] sm:$0xff] }
 0x2f1   : > { %v3172_v43 = vpack.c.bf16 %v1630_v54, %v1628_v31  ;;  %v1525_v27 = vpop.permute.xlu1 %1524  ;;  %v2282_v1 = vpop.permute.xlu0 %2281  ;;  %v3173_v9 = vpack.c.bf16 %v1631_v59, %v1629_v35  ;;  %2055 = vmatprep.mubr.bf16.mxu1 %v4805_v39  ;;  %2510 = vmatprep.subr.bf16.mxu1 %v4806_v48  ;;  %v2213_v12 = vsel %vm1116_vm8, %v4814_v40, %v2208_v16  ;;  %v4819_v59 = vld [vmem:[#allocation27_spill] sm:$0xff]  ;;  %v4824_v48 = vld [vmem:[#allocation21_spill] sm:$0xff] }
 0x2f2   : > { %v2286_v52 = vsel %vm1190_vm6, %v4383_v50, %v2282_v1  ;;  %v2290_v58 = vsel %vm1190_vm6, %v2282_v1, %v4383_v50  ;;  %v1556_v50 = vmul.f32 %v4481_v23, %v1538_v63  ;;  %v1532_v53 = vsel %vm427_vm7, %v4807_v46, %v1525_v27 }
 0x2f3   : > { %v2309_v34 = vmul.f32 %v4314_v28, %v2286_v52  ;;  %v2310_v60 = vmul.f32 %v4317_v47, %v2290_v58  ;;  %2150 = vmatprep.subr.bf16.mxu0 %v3173_v9  ;;  %v4809_v47 = vld [vmem:[#allocation15_spill] sm:$0xff]  ;;  %v1536_v8 = vsel %vm427_vm7, %v1525_v27, %v4807_v46  ;;  %v1553_v30 = vmul.f32 %v1549_v10, %v1532_v53 }
 0x2f4   : > { %2151 = vmatpush1.bf16.msra.mxu0 %v3172_v43  ;;  %v4810_v44 = vpack.c.bf16 %v4808_v20, %v4809_v47  ;;  %v2217_v6 = vsel %vm1116_vm8, %v2208_v16, %v4814_v40  ;;  %v4818_v37 = vpack.c.bf16 %v4816_v14, %v4817_v36  ;;  %v1537_v0 = vsel %vm427_vm7, %v4410_v41, %v4405_v4  ;;  %v4821_v4 = vld [vmem:[#allocation22_spill] sm:$0xff]  ;;  %v4823_v58 = vld [vmem:[#allocation23_spill] sm:$0xff]  ;;  %v3285_v47 = vld [vmem:[#allocation6 + $0x20] sm:$0xff]  }
 0x2f5   : > { %v3184_v28 = vpack.c.bf16 %v2309_v34, %v2307_v57  ;;  %v2196_v45 = vpop.permute.xlu1 %2195  ;;  %2152 = vmatprep.subr.bf16.mxu0 %v4813_v5  ;;  %v1531_v18 = vpop.permute.xlu0 %1530  ;;  %v3185_v55 = vpack.c.bf16 %v2310_v60, %v2308_v61  ;;  %v1555_v42 = vmul.f32 %v1549_v10, %v1533_v51  ;;  %v2235_v54 = vmul.f32 %v4512_v19, %v2213_v12 }
 0x2f6   : > { %2511 = vmatpush1.bf16.msra.mxu1 %v4810_v44  ;;  %v1535_v15 = vsel %vm427_vm7, %v4815_v56, %v1531_v18  ;;  %v1539_v17 = vsel %vm427_vm7, %v1531_v18, %v4815_v56  ;;  %v1552_v16 = vmul.f32 %v4481_v23, %v1536_v8  ;;  %v4822_v41 = vpack.c.bf16 %v4820_v22, %v4821_v4 }
 0x2f7   : > { %v1558_v32 = vmul.f32 %v4481_v23, %v1539_v17  ;;  %v1559_v33 = vmul.f32 %v1549_v10, %v1535_v15  ;;  %2512 = vmatprep.subr.bf16.mxu1 %v3185_v55  ;;  %2990 = vmatmul.mubr.msk.bf16.gmra.mxu1 %vm911_vm3, %v3283_v62  ;;  %v2236_v10 = vmul.f32 %v2228_v24, %v2217_v6 }
 0x2f8   : > { %2153 = vmatpush1.bf16.msra.mxu0 %v4818_v37  ;;  %2536 = vmatprep.mubr.bf16.mxu1 %v4805_v39  ;;  %v3167_v27 = vpack.c.bf16 %v1555_v42, %v1553_v30  ;;  %v1554_v1 = vmul.f32 %v4481_v23, %v1537_v0  ;;  %v4825_v57 = vpack.c.bf16 %v4823_v58, %v4824_v48 }
 0x2f9   : > { %v3168_v29 = vpack.c.bf16 %v1558_v32, %v1556_v50  ;;  %v2204_v31 = vpop.permute.xlu1 %2203  ;;  %v2210_v35 = vpop.permute.xlu0 %2209  ;;  %v3169_v7 = vpack.c.bf16 %v1559_v33, %v1557_v26  ;;  %v3284_v26 = vld [vmem:[#allocation6] sm:$0xff]  }
 0x2fa   : > { %2513 = vmatpush1.bf16.msra.mxu1 %v3184_v28  ;;  %v2214_v25 = vsel %vm1116_vm8, %v4819_v59, %v2210_v35  ;;  %v2218_v3 = vsel %vm1116_vm8, %v2210_v35, %v4819_v59  ;;  %v2211_v9 = vsel %vm1116_vm8, %v2196_v45, %v2204_v31  ;;  %v2215_v2 = vsel %vm1116_vm8, %v2204_v31, %v2196_v45 }
 0x2fb   : > { %2514 = vmatprep.subr.bf16.mxu1 %v4822_v41  ;;  %v2237_v63 = vmul.f32 %v4512_v19, %v2214_v25  ;;  %v2238_v43 = vmul.f32 %v2228_v24, %v2218_v3  ;;  %2154 = vmatprep.subr.bf16.mxu0 %v3169_v7  ;;  %v3166_v60 = vpack.c.bf16 %v1554_v1, %v1552_v16 }
 0x2fc   : > { %2155 = vmatpush1.bf16.msra.mxu0 %v3168_v29  ;;  %v2231_v51 = vmul.f32 %v4512_v19, %v2211_v9  ;;  %v2232_v50 = vmul.f32 %v2228_v24, %v2215_v2 }
 0x2fd   : > { %v3180_v52 = vpack.c.bf16 %v2237_v63, %v2235_v54  ;;  %2156 = vmatprep.subr.bf16.mxu0 %v3167_v27  ;;  %v2206_v61 = vpop.permute.xlu0 %2205  ;;  %v3181_v34 = vpack.c.bf16 %v2238_v43, %v2236_v10 }
 0x2fe   : > { %2515 = vmatpush1.bf16.msra.mxu1 %v4825_v57  ;;  %v2212_v23 = vsel %vm1116_vm8, %v4417_v21, %v2206_v61  ;;  %v2216_v62 = vsel %vm1116_vm8, %v2206_v61, %v4417_v21  ;;  %v3287_v21 = vld [vmem:[#allocation6 + $0x28] sm:$0xff]  }
 0x2ff   : > { %v2233_v46 = vmul.f32 %v4512_v19, %v2212_v23  ;;  %v2234_v53 = vmul.f32 %v2228_v24, %v2216_v62  ;;  %2516 = vmatprep.subr.bf16.mxu1 %v3181_v34 }
 0x300   : > { %2157 = vmatpush1.bf16.msra.mxu0 %v3166_v60 }
 0x301   : > { %v3178_v28 = vpack.c.bf16 %v2233_v46, %v2231_v51  ;;  %v3179_v20 = vpack.c.bf16 %v2234_v53, %v2232_v50 }
 0x302   : > { %2517 = vmatpush1.bf16.msra.mxu1 %v3180_v52 }
 0x303   : > { %3005 = vmatmul.mubr.msk.bf16.vlgmr.msra.gmra.mxu0 %vm911_vm3, %v3284_v26  ;;  %2518 = vmatprep.subr.bf16.mxu1 %v3179_v20  ;;  %v2615_v26 = vld [vmem:[%s4746_s6 + $0x8] sm:$0xff] }
 0x304   : > { %2184 = vmatprep.mubr.bf16.mxu0 %v4805_v39 }
 0x306   : > { %2519 = vmatpush1.bf16.msra.mxu1 %v3178_v28  ;;  %v2572_v14 = vpop.permute.xlu1 %2571 }
 0x309   : > { %3033 = vmatmul.mubr.msk.bf16.vlgmr.msra.gmra.mxu1 %vm911_vm3, %v3285_v47 }
 0x30a   : > { %2546 = vmatprep.mubr.bf16.mxu1 %v4805_v39  ;;  %v2577_v25 = vpop.permute.xlu0 %2576  ;;  %v2582_v2 = vpop.permute.xlu1 %2581 }
 0x30b   : > { %3006 = vmatmul.mubr.msk.bf16.gmra.mxu0 %vm911_vm3, %v3286_v11  ;;  %v2614_v11 = vld [vmem:[%s4746_s6] sm:$0xff] }
 0x30e   : > { %v2587_v62 = vpop.permute.xlu0 %2586 }
 0x311   : > { %3034 = vmatmul.mubr.msk.bf16.gmra.mxu1 %vm911_vm3, %v3287_v21 }
 0x3af   : > { %v2047_v19 = vpop.f32.mrf.mxu1 }
 0x3b1   : > { %v2049_v24 = vpop.f32.mrf.mxu1 }
 0x3b3   : > { %v2051_v44 = vpop.f32.mrf.mxu1 }
 0x3b5   : > { %v2053_v45 = vpop.f32.mrf.mxu1 }
 0x3b7   : > { %v2057_v38 = vpop.f32.mrf.mxu1 }
 0x3b9   : > { %v2059_v49 = vpop.f32.mrf.mxu1 }
 0x3bb   : > { %v2061_v5 = vpop.f32.mrf.mxu1 }
 0x3bd   : > { %v2063_v40 = vpop.f32.mrf.mxu1 }
 0x3c3   : > { %v2176_v18 = vpop.f32.mrf.mxu0 }
 0x3c4   : > { %v2177_v12 = vadd.f32 %v2176_v18, %v2047_v19  ;;  %v2616_v19 = vld [vmem:[%s4746_s6 + $0x10] sm:$0xff] }
 0x3c5   : > { %v2178_v55 = vpop.f32.mrf.mxu0 }
 0x3c6   : > { %v2179_v15 = vadd.f32 %v2178_v55, %v2049_v24 }
 0x3c7   : > { %v2180_v8 = vpop.f32.mrf.mxu0 }
 0x3c8   : > { %v2181_v32 = vadd.f32 %v2180_v8, %v2051_v44 }
 0x3c9   : > { %v2538_v56 = vpop.f32.mrf.mxu1  ;;  %v2182_v17 = vpop.f32.mrf.mxu0 }
 0x3ca   : > { %v2557_v39 = vadd.f32 %v2538_v56, %v2177_v12  ;;  %v2183_v0 = vadd.f32 %v2182_v17, %v2053_v45 }
 0x3cb   : > { %v2540_v30 = vpop.f32.mrf.mxu1  ;;  %v2186_v6 = vpop.f32.mrf.mxu0 }
 0x3cc   : > { %v2558_v33 = vadd.f32 %v2540_v30, %v2179_v15  ;;  %v4601_v37 = vadd.f32 %v2572_v14, %v2557_v39  ;;  %v2187_v7 = vadd.f32 %v2186_v6, %v2057_v38 }
 0x3cd   : > { %v2542_v36 = vpop.f32.mrf.mxu1  ;;  %v2188_v31 = vpop.f32.mrf.mxu0 }
 0x3ce   : > { %v4603_v42 = vadd.f32 %v2572_v14, %v2558_v33  ;;  %v2559_v29 = vadd.f32 %v2542_v36, %v2181_v32  ;;  %v2189_v4 = vadd.f32 %v2188_v31, %v2059_v49  ;;  %v2636_v36 = vld [vmem:[#allocation8] sm:$0x1] }
 0x3cf   : > { %v2544_v35 = vpop.f32.mrf.mxu1  ;;  %v2190_v16 = vpop.f32.mrf.mxu0 }
 0x3d0   : > { %v2560_v54 = vadd.f32 %v2544_v35, %v2183_v0  ;;  %v2597_v59 = vadd.f32 %v4603_v42, %v4601_v37  ;;  %v4607_v22 = vadd.f32 %v2577_v25, %v2559_v29  ;;  %v2191_v27 = vadd.f32 %v2190_v16, %v2061_v5  ;;  %v2617_v5 = vld [vmem:[%s4746_s6 + $0x18] sm:$0xff]  ;;  %v2640_v35 = vld [vmem:[%s4748_s8 + $0x8] sm:$0xff] }
 0x3d1   : > { %v2548_v3 = vpop.f32.mrf.mxu1  ;;  %v2192_v63 = vpop.f32.mrf.mxu0  ;;  %v2642_v16 = vld [vmem:[%s4748_s8 + $0x18] sm:$0xff] }
 0x3d2   : > { %v4609_v41 = vadd.f32 %v2577_v25, %v2560_v54  ;;  %v2561_v10 = vadd.f32 %v2548_v3, %v2187_v7  ;;  %2598 = vadd.xlane.f32.xlu1 %v2597_v59  ;;  %v2193_v48 = vadd.f32 %v2192_v63, %v2063_v40  ;;  %v2639_v7 = vld [vmem:[%s4748_s8] sm:$0xff]  ;;  %v2641_v59 = vld [vmem:[%s4748_s8 + $0x10] sm:$0xff] }
 0x3d3   : > { %v2550_v43 = vpop.f32.mrf.mxu1 }
 0x3d4   : > { %v2562_v1 = vadd.f32 %v2550_v43, %v2189_v4  ;;  %v2600_v9 = vadd.f32 %v4609_v41, %v4607_v22  ;;  %v4613_v58 = vadd.f32 %v2582_v2, %v2561_v10 }
 0x3d5   : > { %v2552_v52 = vpop.f32.mrf.mxu1 }
 0x3d6   : > { %v4615_v57 = vadd.f32 %v2582_v2, %v2562_v1  ;;  %v2563_v61 = vadd.f32 %v2552_v52, %v2191_v27  ;;  %2601 = vadd.xlane.f32.xlu0 %v2600_v9  ;;  %v2664_v1 = vld [vmem:[%s4749_s9 + $0x8] sm:$0xff]  ;;  %v2663_v9 = vld [vmem:[%s4749_s9] sm:$0xff] }
 0x3d7   : > { %v2554_v34 = vpop.f32.mrf.mxu1 }
 0x3d8   : > { %v2564_v60 = vadd.f32 %v2554_v34, %v2193_v48  ;;  %v2603_v23 = vadd.f32 %v4615_v57, %v4613_v58  ;;  %v4619_v51 = vadd.f32 %v2587_v62, %v2563_v61  ;;  %v2666_v34 = vld [vmem:[%s4749_s9 + $0x18] sm:$0xff] }
 0x3da   : > { %v4621_v50 = vadd.f32 %v2587_v62, %v2564_v60  ;;  %2604 = vadd.xlane.f32.xlu0 %v2603_v23  ;;  %v2665_v60 = vld [vmem:[%s4749_s9 + $0x10] sm:$0xff] }
 0x3dc   : > { %v2606_v46 = vadd.f32 %v4621_v50, %v4619_v51 }
 0x3de   : > { %2607 = vadd.xlane.f32.xlu1 %v2606_v46 }
 0x45b   : > { %v2599_v53 = vpop.xlane.xlu1 %2598 }
 0x45c   : > { %v2610_v20 = vmul.f32 0.00390625, %v2599_v53 }
 0x45e   : > { %v2618_v44 = vmul.f32 %v2614_v11, %v2610_v20 }
 0x45f   : > { %v2602_v28 = vpop.xlane.xlu0 %2601 }
 0x460   : > { %v2611_v47 = vmul.f32 0.00390625, %v2602_v28  ;;  %v2623_v55 = vsel %vm2622_vm9, %v2618_v44, 0.0 }
 0x462   : > { %v2619_v21 = vmul.f32 %v2615_v26, %v2611_v47 }
 0x463   : > { %v2605_v24 = vpop.xlane.xlu0 %2604 }
 0x464   : > { %v2612_v45 = vmul.f32 0.00390625, %v2605_v24  ;;  %v2624_v38 = vsel %vm2622_vm9, %v2619_v21, 0.0 }
 0x465   : > { %v2625_v8 = vadd.f32 %v2624_v38, %v2623_v55 }
 0x466   : > { %v2620_v49 = vmul.f32 %v2616_v19, %v2612_v45 }
 0x467   : > { %v2608_v18 = vpop.xlane.xlu1 %2607 }
 0x468   : > { %v2626_v40 = vsel %vm2622_vm9, %v2620_v49, 0.0  ;;  %v2613_v12 = vmul.f32 0.00390625, %v2608_v18 }
 0x469   : > { %v2627_v15 = vadd.f32 %v2626_v40, %v2625_v8 }
 0x46a   : > { %v2621_v56 = vmul.f32 %v2617_v5, %v2613_v12 }
 0x46c   : > { %v2628_v39 = vsel %vm2622_vm9, %v2621_v56, 0.0 }
 0x46d   : > { %v2629_v17 = vadd.f32 %v2628_v39, %v2627_v15 }
 0x46f   : > { %v2630_v30 = vrot.slane %v2629_v17, 4 }
 0x471   : > { %v2631_v32 = vadd.f32 %v2630_v30, %v2629_v17  ;;  %v3304_v30 = vld [vmem:[%s3635_s26 + $0x10] sm:$0xff] }
 0x473   : > { %v2632_v33 = vrot.slane %v2631_v32, 2 }
 0x475   : > { %v2633_v6 = vadd.f32 %v2632_v33, %v2631_v32  ;;  %v3305_v33 = vld [vmem:[%s3635_s26 + $0x18] sm:$0xff] }
 0x477   : > { %v2634_v14 = vrot.slane %v2633_v6, 1 }
 0x479   : > { %v2635_v0 = vadd.f32 %v2634_v14, %v2633_v6  ;;  %v3306_v14 = vld [vmem:[%s3635_s26] sm:$0xff] }
 0x47b   : > { %v2637_v29 = vadd.f32 %v2636_v36, %v2635_v0  ;;  %v3307_v0 = vld [vmem:[%s3635_s26 + $0x8] sm:$0xff] }
 0x47d   : > { %v2638_v31 = vmax.f32 %v2637_v29, 0.0 }
 0x47f   : > { %v2646_v54 = vrot.slane %v2638_v31, %v3785_v13 }
 0x481   : > { %v2648_v25 = vmul.f32 %v2646_v54, %v2640_v35  ;;  %v2647_v3 = vmul.f32 %v2646_v54, %v2639_v7  ;;  %v2650_v63 = vmul.f32 %v2646_v54, %v2642_v16  ;;  %v2649_v43 = vmul.f32 %v2646_v54, %v2641_v59  ;;  %v3308_v7 = vld [vmem:[%s3635_s26 + $0x20] sm:$0xff]  ;;  %v3309_v16 = vld [vmem:[%s3635_s26 + $0x28] sm:$0xff] }
 0x483   : > { %v2654_v4 = vsel %vm2622_vm9, %v2648_v25, 0.0  ;;  %v2651_v10 = vsel %vm2622_vm9, %v2647_v3, 0.0  ;;  %v2660_v13 = vsel %vm2622_vm9, %v2650_v63, 0.0  ;;  %v2657_v27 = vsel %vm2622_vm9, %v2649_v43, 0.0  ;;  %v3310_v25 = vld [vmem:[%s3635_s26 + $0x30] sm:$0xff] }
 0x484   : > { %2655 = vadd.xlane.f32.xlu1 %v2654_v4  ;;  %2652 = vadd.xlane.f32.xlu0 %v2651_v10 }
 0x488   : > { %2661 = vadd.xlane.f32.xlu1 %v2660_v13  ;;  %2658 = vadd.xlane.f32.xlu0 %v2657_v27 }
 0x50d   : > { %v2656_v2 = vpop.xlane.xlu1 %2655  ;;  %v2653_v52 = vpop.xlane.xlu0 %2652 }
 0x50e   : > { %v2668_v48 = vadd.f32 %v2664_v1, %v2656_v2  ;;  %v2667_v61 = vadd.f32 %v2663_v9, %v2653_v52 }
 0x510   : > { %v3036_v23 = vmul.f32 -1.442695, %v2668_v48  ;;  %v3035_v62 = vmul.f32 -1.442695, %v2667_v61 }
 0x511   : > { %v2662_v46 = vpop.xlane.xlu1 %2661  ;;  %v2659_v53 = vpop.xlane.xlu0 %2658 }
 0x512   : > { %3288 = vpow2.f32 %v3036_v23  ;;  %v2670_v26 = vadd.f32 %v2666_v34, %v2662_v46  ;;  %v2669_v28 = vadd.f32 %v2665_v60, %v2659_v53 }
 0x513   : > { %3290 = vpow2.f32 %v3035_v62 }
 0x514   : > { %v3038_v20 = vmul.f32 -1.442695, %v2670_v26  ;;  %v3037_v47 = vmul.f32 -1.442695, %v2669_v28 }
 0x516   : > { %3292 = vpow2.f32 %v3038_v20 }
 0x517   : > { %3294 = vpow2.f32 %v3037_v47 }
 0x51f   : > { %v3289_v11 = vpop.eup %3288 }
 0x520   : > { %v3291_v21 = vpop.eup %3290  ;;  %v2684_v19 = vadd.f32 1.0, %v3289_v11 }
 0x521   : > { %v2683_v24 = vadd.f32 1.0, %v3291_v21 }
 0x522   : > { %3296 = vrcp.f32 %v2684_v19 }
 0x523   : > { %v3293_v44 = vpop.eup %3292  ;;  %3298 = vrcp.f32 %v2683_v24 }
 0x524   : > { %v3295_v45 = vpop.eup %3294  ;;  %v2686_v38 = vadd.f32 1.0, %v3293_v44 }
 0x525   : > { %v2685_v49 = vadd.f32 1.0, %v3295_v45 }
 0x526   : > { %3300 = vrcp.f32 %v2686_v38 }
 0x527   : > { %3302 = vrcp.f32 %v2685_v49 }
 0x52f   : > { %v3297_v5 = vpop.eup %3296 }
 0x530   : > { %v3299_v18 = vpop.eup %3298  ;;  %2702 = vperm.xlu1 %3275, %v3297_v5  }
 0x531   : > { %2697 = vperm.xlu0 %3274, %v3299_v18  }
 0x533   : > { %v3301_v55 = vpop.eup %3300 }
 0x534   : > { %v3303_v40 = vpop.eup %3302 }
 0x535   : > { %2712 = vperm.xlu0 %3274, %v3301_v55   ;;  %2707 = vperm.xlu1 %3275, %v3303_v40  }
 0x5ab   : > { %v2703_v12 = vpop.permute.xlu1 %2702 }
 0x5ac   : > { %v2717_v8 = vmul.f32 %v2703_v12, %v4607_v22  ;;  %v2718_v56 = vmul.f32 %v2703_v12, %v4609_v41  ;;  %v2698_v15 = vpop.permute.xlu0 %2697 }
 0x5ad   : > { %v2715_v39 = vmul.f32 %v2698_v15, %v4601_v37  ;;  %v2716_v17 = vmul.f32 %v2698_v15, %v4603_v42 }
 0x5ae   : > { %v2725_v32 = vadd.f32 %v3304_v30, %v2717_v8  ;;  %v2726_v6 = vadd.f32 %v3305_v33, %v2718_v56 }
 0x5af   : > { %v2723_v36 = vadd.f32 %v3306_v14, %v2715_v39  ;;  %v2724_v29 = vadd.f32 %v3307_v0, %v2716_v17 }
 0x5b0   : > { %2733 = vst [vmem:[%s394_s27 + $0x10] sm:$0xff] %v2725_v32  ;;  %2734 = vst [vmem:[%s394_s27 + $0x18] sm:$0xff] %v2726_v6  ;;  %v2708_v22 = vpop.permute.xlu1 %2707  ;;  %v2713_v37 = vpop.permute.xlu0 %2712 }
 0x5b1   : > { %2731 = vst [vmem:[%s394_s27] sm:$0xff] %v2723_v36  ;;  %2732 = vst [vmem:[%s394_s27 + $0x8] sm:$0xff] %v2724_v29  ;;  %v2719_v42 = vmul.f32 %v2708_v22, %v4613_v58  ;;  %v2720_v41 = vmul.f32 %v2708_v22, %v4615_v57  ;;  %v2721_v31 = vmul.f32 %v2713_v37, %v4619_v51  ;;  %v3311_v58 = vld [vmem:[%s3635_s26 + $0x38] sm:$0xff]  ;;  %s3394_s26 = sshll.u32 %s3476_s28, 4  ;;  %s3395_s26 = int_to_ptr.vmem [resolvable:$false] %s3394_s26 }
 0x5b2   : > { %v2722_v35 = vmul.f32 %v2713_v37, %v4621_v50  ;;  %s3396_s21 = scalar_lea.vmem %s3395_s26, 2048  ;;  %p3397_p6 = scmp.lt.s32.totalorder %s4695_s12, %s3395_s26 }
 0x5b3   : > { %v2727_v54 = vadd.f32 %v3308_v7, %v2719_v42  ;;  %v2728_v59 = vadd.f32 %v3309_v16, %v2720_v41  ;;  %v2729_v3 = vadd.f32 %v3310_v25, %v2721_v31  ;;  %p3398_p9 = scmp.lt.s32.totalorder %s3396_s21, %s3390_s22 }
 0x5b4   : > { %v2730_v4 = vadd.f32 %v3311_v58, %v2722_v35 }
 0x5b5   : > { %2735 = vst [vmem:[%s394_s27 + $0x20] sm:$0xff] %v2727_v54  ;;  %2736 = vst [vmem:[%s394_s27 + $0x28] sm:$0xff] %v2728_v59  ;;  %p3399_p8 = por %p3398_p9, %p3397_p6 }
 0x5b6   : > { %2737 = vst [vmem:[%s394_s27 + $0x30] sm:$0xff] %v2729_v3  ;;  %2738 = vst [vmem:[%s394_s27 + $0x38] sm:$0xff] %v2730_v4 }
 0x5b7   : > { %p3400_p11 = pnand %p3399_p8, %p3393_p7 }
 0x5b9   : > { %3403 = shalt.err (!%p3400_p11)
}
 0x5ba   : > { %s3404_s15 = scalar_lea.hbm %s4689_s30, 1024  ;;  %s3408_s27 = scalar_lea.hbm %s4750_s10, 2048 }
 0x5bb   : > { %p3405_p0 = scmp.ne.s32.totalorder %s4689_s30, %s3404_s15  ;;  %p3409_p3 = scmp.lt.s32.totalorder %s4689_s30, %s4750_s10 }
 0x5bc   : > { %p3410_p2 = scmp.lt.s32.totalorder %s3408_s27, %s3404_s15 }
 0x5bd   : > { %p3406_p1 = pnand %p3405_p0, %p3571_p5 }
 0x5be   : > { %p3411_p4 = por %p3410_p2, %p3409_p3 }
 0x5bf   : > { %p3407_p13 = pneg %p3406_p1 }
 0x5c1   : > { %p3412_p10 = pnand %p3411_p4, %p3407_p13 }
 0x5c3   : > { %3415 = shalt.err (!%p3412_p10)
}
 0x5c4   : > { %s3477_s22 = smov 256  }
 0x5c5   : > { %3202 = dma.vmem_to_hbm [thread:$0]  (%p3571_p5), %s4695_s12, 1024, %s4689_s30, %s4699_s25, %s3477_s22, %s3477_s22, %s3472_s18  }
 0x5c6 PF: > { %p3224_p12 = scmp.ge.s32.totalorder %s3458_s16, 2  ;;  %s2768_s28 = sand.u32 1, %s3446_s13  }
 0x5c7   : > { %p4826_p7 = scmp.ne.s32.totalorder %s4776_s24, 0  ;;  %s2769_s26 = scalar_lea.sflag [#allocation5], %s2768_s28 }
 0x5c9   : > { %p3215_p6 = pnand %p3224_p12, %p4826_p7 }
 0x5cb   : > { %p3216_p9 = pneg %p3215_p6 }
 0x5cd   : > { %3441 = dma.done.wait (%p3216_p9), %s2769_s26, 1024  }
 0x5ce   : > { %3443 = vsyncadd (%p3216_p9), %s2769_s26, 4294966272  ;;  %s4827_s23 = sld [smem:[#allocation13_spill]]  ;;  %p22_p8 = scmp.ge.s32.totalorder %s3558_s19, 4  }
 0x5cf   : > { %s4828_s15 = sld [smem:[#allocation14_spill]]  ;;  %s4829_s13 = smov %s3450_s14 }
 0x5d0   : > { %s4831_s16 = smov %s3558_s19  ;;  %24 = sbr.rel (!%p22_p8) target bundleno = 5 (0x5), region = 119 }
 0x5d4   : > { %s4830_s14 = smov %s4827_s23 }
 0x5d5   :  { %2774 = vsyncpa [#allocation4], 1 }
 0x5d6   :  { %2776 = vsyncpa [#allocation4 + $0x1], 1 }
 0x5d7   :  { %2777 = vsyncpa [#allocation7], 1 }
 0x5d8   :  { %2778 = vsyncpa [#allocation5], 1 }
 0x5d9   :  { %2780 = vsyncpa [#allocation5 + $0x1], 1 }

</bundles_post_ra>
